<compile_context>
chip_gen: v7x
topology: tpu7x:2x2x1
jax: 0.10.0
libtpu: 0.0.40
codegen_flags: <defaults>
</compile_context>

<pallas_src>
import functools

import jax
import jax.numpy as jnp
import numpy as np
from jax.experimental import pallas as pl
from jax.experimental.pallas import tpu as pltpu


# ----------------------------------------------------------------------------
# Matmul helper: fast = single-pass bf16 operands, f32 accumulate (native MXU
# mode); exact = full-f32 (6-pass) for callers needing tight accuracy.
# ----------------------------------------------------------------------------
def _dot(a, b, exact):
    if exact:
        return jnp.dot(a, b, preferred_element_type=jnp.float32,
                       precision=jax.lax.Precision.HIGHEST)
    return jnp.dot(a.astype(jnp.bfloat16), b.astype(jnp.bfloat16),
                   preferred_element_type=jnp.float32)


# ----------------------------------------------------------------------------
# Kernels
# ----------------------------------------------------------------------------
def _resize_folded_col_first(wh_ref, x_ref, wwt_ref, o_ref, *, exact):
    """CB channels per step, image laid out 2-D as (CB*H, W).

    Column pass is ONE MXU matmul with the CB channels folded into the M dim;
    the row pass is a small unrolled per-channel loop.
    """
    new_h, h = wh_ref.shape
    cb = x_ref.shape[0] // h
    tmp = _dot(x_ref[...], wwt_ref[...], exact)              # (CB*H, new_w) f32
    for c in range(cb):                                      # CB static -> unrolled
        o_ref[pl.ds(c * new_h, new_h), :] = _dot(
            wh_ref[...], tmp[c * h:(c + 1) * h, :], exact).astype(o_ref.dtype)


def _resize_folded_row_first(wh_ref, x_ref, wwt_ref, o_ref, tmp_ref, *, exact):
    """Row pass per channel into a stacked VMEM scratch, then one folded
    (CB*new_h, W) @ Wwt column matmul straight into the output block."""
    new_h, h = wh_ref.shape
    cb = x_ref.shape[0] // h
    for c in range(cb):
        tmp_ref[pl.ds(c * new_h, new_h), :] = _dot(
            wh_ref[...], x_ref[pl.ds(c * h, h), :], exact).astype(tmp_ref.dtype)
    o_ref[...] = _dot(tmp_ref[...], wwt_ref[...], exact).astype(o_ref.dtype)


def _resize_per_channel(wh_ref, x_ref, wwt_ref, o_ref, *, rows_first, exact):
    """Fallback for sublane-unaligned H/new_h: (CB, H, W) block, per-channel
    matmuls (block's last two dims equal the full array dims -> always legal)."""
    cb = x_ref.shape[0]
    for c in range(cb):
        if rows_first:
            o_ref[c] = _dot(_dot(wh_ref[...], x_ref[c], exact),
                            wwt_ref[...], exact).astype(o_ref.dtype)
        else:
            o_ref[c] = _dot(wh_ref[...],
                            _dot(x_ref[c], wwt_ref[...], exact), exact).astype(o_ref.dtype)


# ----------------------------------------------------------------------------
# Host-side helpers
# ----------------------------------------------------------------------------
def _bilinear_matrix_np(out_size, in_size):
    """(out_size, in_size) bilinear interpolation matrix, half-pixel centres."""
    i = np.arange(out_size, dtype=np.float64)
    src = (i + 0.5) * (in_size / out_size) - 0.5
    i0 = np.floor(src).astype(np.int64)
    frac = src - i0
    i0c = np.clip(i0, 0, in_size - 1)
    i1c = np.clip(i0 + 1, 0, in_size - 1)
    cols = np.arange(in_size)
    w = ((cols[None, :] == i0c[:, None]) * (1.0 - frac)[:, None]
         + (cols[None, :] == i1c[:, None]) * frac[:, None])
    return w.astype(np.float32)


@functools.lru_cache(maxsize=64)
def _interp_weights(new_h, new_w, h, w, dtype):
    """Device-resident interpolation matrices, cached across calls."""
    wh = jnp.asarray(_bilinear_matrix_np(new_h, h)).astype(dtype)     # (new_h, h)
    wwt = jnp.asarray(_bilinear_matrix_np(new_w, w).T).astype(dtype)  # (w, new_w)
    return wh, wwt


def _pad(a, m):
    return -(-a // m) * m


def _pick_channel_block(nc, h, w, new_h, new_w):
    """Channels per grid step: a divisor of nc that keeps >=2 grid steps (v7x
    has 2 TensorCores), fits a conservative per-step VMEM budget, and stops
    growing once the folded matmul M dim already fills the 256-wide MXU."""
    if nc <= 1:
        return 1
    per_ch = 4 * (_pad(h, 8) * _pad(w, 128)
                  + _pad(new_h, 8) * _pad(new_w, 128)
                  + max(_pad(h, 8) * _pad(new_w, 128), _pad(new_h, 8) * _pad(w, 128)))
    budget = 20 * 2**20            # headroom under v7x's 32 MiB default scoped VMEM
    best = 1
    for cb in range(1, nc):        # cb < nc  =>  at least 2 grid steps
        if nc % cb:
            continue
        if 2 * cb * per_ch > budget:
            break
        best = cb
        if cb * min(h, new_h) >= 256:
            break
    return best


def _vmem_limit_bytes(cb, h, w, new_h, new_w):
    blocks = 4 * cb * (_pad(h, 8) * _pad(w, 128) + _pad(new_h, 8) * _pad(new_w, 128))
    weights = 4 * (_pad(new_h, 8) * _pad(h, 128) + _pad(w, 8) * _pad(new_w, 128))
    interm = 4 * cb * max(_pad(h, 8) * _pad(new_w, 128), _pad(new_h, 8) * _pad(w, 128))
    est = 2 * blocks + weights + interm        # image/output double-buffered
    return int(min(64 * 2**20, max(32 * 2**20, 2 * est)))   # v7x-safe cap


def _weight_spec(shape, single_buffer):
    """Resident weight block (constant index_map); single-buffered when the
    running jax supports BlockSpec.pipeline_mode (halves its VMEM footprint)."""
    if single_buffer:
        return pl.BlockSpec(shape, lambda i: (0, 0), pipeline_mode=pl.Buffered(1))
    return pl.BlockSpec(shape, lambda i: (0, 0))


def _resize_images(x, wh, wwt, new_h, new_w, out_dtype, exact, single_buffer_weights):
    """x: f32[nc, h, w] -> [nc, new_h, new_w] in out_dtype."""
    nc, h, w = x.shape
    cb = _pick_channel_block(nc, h, w, new_h, new_w)
    steps = nc // cb
    rows_first = (new_h * w) <= (h * new_w)      # smaller intermediate / fewer FLOPs
    folded = (h % 8 == 0) and (new_h % 8 == 0)   # sublane-aligned 2-D folded layout ok

    params = pltpu.CompilerParams(
        dimension_semantics=(pltpu.PARALLEL,),
        vmem_limit_bytes=_vmem_limit_bytes(cb, h, w, new_h, new_w),
    )
    wh_spec = _weight_spec((new_h, h), single_buffer_weights)
    wwt_spec = _weight_spec((w, new_w), single_buffer_weights)

    if folded:
        x2 = x.reshape(nc * h, w)                # free reshape in XLA
        if rows_first:
            kernel = functools.partial(_resize_folded_row_first, exact=exact)
            scratch = [pltpu.VMEM((cb * new_h, w),
                                  jnp.float32 if exact else jnp.bfloat16)]
        else:
            kernel = functools.partial(_resize_folded_col_first, exact=exact)
            scratch = []
        out = pl.pallas_call(
            kernel,
            out_shape=jax.ShapeDtypeStruct((nc * new_h, new_w), out_dtype),
            grid_spec=pltpu.PrefetchScalarGridSpec(
                num_scalar_prefetch=0,
                grid=(steps,),
                in_specs=[wh_spec,
                          pl.BlockSpec((cb * h, w), lambda i: (i, 0)),
                          wwt_spec],
                out_specs=pl.BlockSpec((cb * new_h, new_w), lambda i: (i, 0)),
                scratch_shapes=scratch,
            ),
            compiler_params=params,
        )(wh, x2, wwt)
        return out.reshape(nc, new_h, new_w)

    out = pl.pallas_call(
        functools.partial(_resize_per_channel, rows_first=rows_first, exact=exact),
        out_shape=jax.ShapeDtypeStruct((nc, new_h, new_w), out_dtype),
        grid_spec=pltpu.PrefetchScalarGridSpec(
            num_scalar_prefetch=0,
            grid=(steps,),
            in_specs=[wh_spec,
                      pl.BlockSpec((cb, h, w), lambda i: (i, 0, 0)),
                      wwt_spec],
            out_specs=pl.BlockSpec((cb, new_h, new_w), lambda i: (i, 0, 0)),
        ),
        compiler_params=params,
    )(wh, x, wwt)
    return out


def resize(image, target, new_h, new_w, *, exact=False):
    """JAX/Pallas equivalent of Resize(new_h, new_w).forward(image, target).

    image : [N, C, H, W] (computed in f32/bf16 on the MXU, cast back to dtype)
    target: dict with 'boxes' [nb, 4] in xyxy (other keys passed through)
    exact : False -> single-pass bf16 MXU (fast; abs err ~1e-2 on [0,1] data,
            comparable to PIL's own uint8 rounding).  True -> full-f32 matmuls.
    """
    n, c, h, w = image.shape
    nc = n * c

    weight_dtype = jnp.float32 if exact else jnp.bfloat16
    wh, wwt = _interp_weights(new_h, new_w, h, w, weight_dtype)

    x = image.reshape(nc, h, w)
    if x.dtype != jnp.float32:
        x = x.astype(jnp.float32)

    try:
        out = _resize_images(x, wh, wwt, new_h, new_w, image.dtype, exact, True)
    except Exception:
        # Older jax without BlockSpec.pipeline_mode / Buffered(1): retry with
        # default double-buffered weight blocks.
        out = _resize_images(x, wh, wwt, new_h, new_w, image.dtype, exact, False)
    out_img = out.reshape(n, c, new_h, new_w)

    # Box rescaling: plain jnp (XLA fuses a (nb,4) multiply for free; a Pallas
    # launch here was pure overhead and also broke for nb == 0).
    boxes = target["boxes"]
    scale = jnp.array([new_w / w, new_h / h, new_w / w, new_h / h], dtype=boxes.dtype)
    new_target = dict(target)
    new_target["boxes"] = boxes * scale
    return out_img, new_target


# ----------------------------------------------------------------------------
# NumPy reference (direct per-pixel bilinear lerp, independent of the matrices)
# ----------------------------------------------------------------------------
def _ref_resize_np(img, new_h, new_w):
    n, c, h, w = img.shape
    ys = (np.arange(new_h) + 0.5) * (h / new_h) - 0.5
    xs = (np.arange(new_w) + 0.5) * (w / new_w) - 0.5
    y0 = np.floor(ys).astype(np.int64)
    x0 = np.floor(xs).astype(np.int64)
    fy = ys - y0
    fx = xs - x0
    y0c = np.clip(y0, 0, h - 1)
    y1c = np.clip(y0 + 1, 0, h - 1)
    x0c = np.clip(x0, 0, w - 1)
    x1c = np.clip(x0 + 1, 0, w - 1)
    out = np.empty((n, c, new_h, new_w), np.float64)
    for oy in range(new_h):
        row0 = img[:, :, y0c[oy], :].astype(np.float64)
        row1 = img[:, :, y1c[oy], :].astype(np.float64)
        top = row0[:, :, x0c] * (1.0 - fx) + row0[:, :, x1c] * fx
        bot = row1[:, :, x0c] * (1.0 - fx) + row1[:, :, x1c] * fx
        out[:, :, oy, :] = top * (1.0 - fy[oy]) + bot * fy[oy]
    return out.astype(np.float32)


def _check_one(key, n, c, h, w, new_h, new_w, nb, exact):
    k_img, k_box = jax.random.split(key)
    image = jax.random.uniform(k_img, (n, c, h, w), dtype=jnp.float32)
    boxes = jax.random.uniform(k_box, (nb, 4), dtype=jnp.float32) * jnp.array(
        [w, h, w, h], dtype=jnp.float32)
    target = {"boxes": boxes, "labels": jnp.arange(nb, dtype=jnp.int32)}

    out_img, out_target = resize(image, target, new_h, new_w, exact=exact)
    out_img = jax.block_until_ready(out_img)
    out_boxes = jax.block_until_ready(out_target["boxes"])

    ref_img = _ref_resize_np(np.asarray(image), new_h, new_w)
    assert out_img.shape == (n, c, new_h, new_w)
    # exact: full-f32 matmuls.  fast: bf16 operands -> rounding envelope ~1e-2
    # on [0,1] data (comparable to PIL's uint8 quantisation).
    tol = 1e-4 if exact else 2e-2
    assert np.allclose(np.asarray(out_img), ref_img, atol=tol, rtol=tol), (
        f"image resize mismatch ({h}x{w} -> {new_h}x{new_w}, exact={exact})")

    sx, sy = new_w / w, new_h / h
    ref_boxes = np.asarray(boxes) * np.array([sx, sy, sx, sy], np.float32)
    assert out_boxes.shape == (nb, 4)
    assert np.allclose(np.asarray(out_boxes), ref_boxes, atol=1e-5, rtol=1e-5), \
        "box rescale mismatch"
    assert np.array_equal(np.asarray(out_target["labels"]),
                          np.asarray(target["labels"]))


if __name__ == "__main__":
    key = jax.random.PRNGKey(0)
    k1, k2, k3 = jax.random.split(key, 3)
    # Folded 2-D layout, row-pass-first order (new_h*W <= H*new_w):
    #   exact path validates the interpolation math tightly, fast path the bf16 MXU path.
    _check_one(k1, 2, 3, 16, 16, 24, 32, nb=5, exact=True)
    _check_one(k1, 2, 3, 16, 16, 24, 32, nb=5, exact=False)
    # Folded 2-D layout, column-pass-first order.
    _check_one(k2, 2, 3, 16, 16, 32, 24, nb=3, exact=False)
    # Sublane-unaligned H -> per-channel fallback layout; also exercises nb == 0 boxes.
    _check_one(k3, 1, 2, 10, 12, 14, 20, nb=0, exact=True)
    print("KERNEL_OK")
</pallas_src>

<mosaic_0001>
module attributes {stable_mosaic.version = 11 : i64} {
  func.func @_resize_folded_row_first(%arg0: i32, %arg1: memref<24x16xf32, #tpu.memory_space<vmem>>, %arg2: memref<48x16xf32, #tpu.memory_space<vmem>>, %arg3: memref<16x32xf32, #tpu.memory_space<vmem>>, %arg4: memref<72x32xf32, #tpu.memory_space<vmem>>, %arg5: memref<72x16xf32, #tpu.memory_space<vmem>>) attributes {dimension_semantics = [#tpu.dimension_semantics<parallel>], iteration_bounds = array<i64: 2>, scalar_prefetch = 0 : i64, scratch_operands = 1 : i64, tpu.core_type = #tpu.core_type<tc>, window_params = [{pipeline_mode = #tpu.pipeline_mode<synchronous>, transform_indices = @transform_0, window_bounds = array<i64: 24, 16>}, {transform_indices = @transform_1, window_bounds = array<i64: 48, 16>}, {pipeline_mode = #tpu.pipeline_mode<synchronous>, transform_indices = @transform_2, window_bounds = array<i64: 16, 32>}, {transform_indices = @transform_3, window_bounds = array<i64: 72, 32>}]} {
    %c0 = arith.constant 0 : index
    %c0_0 = arith.constant 0 : index
    %0 = vector.load %arg1[%c0, %c0_0] : memref<24x16xf32, #tpu.memory_space<vmem>>, vector<24x16xf32>
    %c0_1 = arith.constant 0 : index
    %c0_2 = arith.constant 0 : index
    %1 = vector.load %arg2[%c0_1, %c0_2] : memref<48x16xf32, #tpu.memory_space<vmem>>, vector<16x16xf32>
    %cst = arith.constant dense<0.000000e+00> : vector<24x16xf32>
    %2 = tpu.matmul %0, %1, %cst {dimension_numbers = #tpu.dot_dimension_numbers<[1], [0], [0], [1], [0, 0, 1, 1], [], []>, precision = #tpu.contract_precision<fp32>} : vector<24x16xf32>, vector<16x16xf32>, vector<24x16xf32> -> vector<24x16xf32>
    %c0_3 = arith.constant 0 : index
    %c0_4 = arith.constant 0 : index
    %3 = vector.load %arg5[%c0_3, %c0_4] : memref<72x16xf32, #tpu.memory_space<vmem>>, vector<24x16xf32>
    tpu.vector_store %arg5[%c0_3, %c0_4], %2 {strides = array<i32>} : memref<72x16xf32, #tpu.memory_space<vmem>>, vector<24x16xf32>,
    %c0_5 = arith.constant 0 : index
    %c0_6 = arith.constant 0 : index
    %4 = vector.load %arg1[%c0_5, %c0_6] : memref<24x16xf32, #tpu.memory_space<vmem>>, vector<24x16xf32>
    %c16 = arith.constant 16 : index
    %c0_7 = arith.constant 0 : index
    %5 = vector.load %arg2[%c16, %c0_7] : memref<48x16xf32, #tpu.memory_space<vmem>>, vector<16x16xf32>
    %cst_8 = arith.constant dense<0.000000e+00> : vector<24x16xf32>
    %6 = tpu.matmul %4, %5, %cst_8 {dimension_numbers = #tpu.dot_dimension_numbers<[1], [0], [0], [1], [0, 0, 1, 1], [], []>, precision = #tpu.contract_precision<fp32>} : vector<24x16xf32>, vector<16x16xf32>, vector<24x16xf32> -> vector<24x16xf32>
    %c24 = arith.constant 24 : index
    %c0_9 = arith.constant 0 : index
    %7 = vector.load %arg5[%c24, %c0_9] : memref<72x16xf32, #tpu.memory_space<vmem>>, vector<24x16xf32>
    tpu.vector_store %arg5[%c24, %c0_9], %6 {strides = array<i32>} : memref<72x16xf32, #tpu.memory_space<vmem>>, vector<24x16xf32>,
    %c0_10 = arith.constant 0 : index
    %c0_11 = arith.constant 0 : index
    %8 = vector.load %arg1[%c0_10, %c0_11] : memref<24x16xf32, #tpu.memory_space<vmem>>, vector<24x16xf32>
    %c32 = arith.constant 32 : index
    %c0_12 = arith.constant 0 : index
    %9 = vector.load %arg2[%c32, %c0_12] : memref<48x16xf32, #tpu.memory_space<vmem>>, vector<16x16xf32>
    %cst_13 = arith.constant dense<0.000000e+00> : vector<24x16xf32>
    %10 = tpu.matmul %8, %9, %cst_13 {dimension_numbers = #tpu.dot_dimension_numbers<[1], [0], [0], [1], [0, 0, 1, 1], [], []>, precision = #tpu.contract_precision<fp32>} : vector<24x16xf32>, vector<16x16xf32>, vector<24x16xf32> -> vector<24x16xf32>
    %c48 = arith.constant 48 : index
    %c0_14 = arith.constant 0 : index
    %11 = vector.load %arg5[%c48, %c0_14] : memref<72x16xf32, #tpu.memory_space<vmem>>, vector<24x16xf32>
    tpu.vector_store %arg5[%c48, %c0_14], %10 {strides = array<i32>} : memref<72x16xf32, #tpu.memory_space<vmem>>, vector<24x16xf32>,
    %c0_15 = arith.constant 0 : index
    %c0_16 = arith.constant 0 : index
    %12 = vector.load %arg5[%c0_15, %c0_16] : memref<72x16xf32, #tpu.memory_space<vmem>>, vector<72x16xf32>
    %c0_17 = arith.constant 0 : index
    %c0_18 = arith.constant 0 : index
    %13 = vector.load %arg3[%c0_17, %c0_18] : memref<16x32xf32, #tpu.memory_space<vmem>>, vector<16x32xf32>
    %cst_19 = arith.constant dense<0.000000e+00> : vector<72x32xf32>
    %14 = tpu.matmul %12, %13, %cst_19 {dimension_numbers = #tpu.dot_dimension_numbers<[1], [0], [0], [1], [0, 0, 1, 1], [], []>, precision = #tpu.contract_precision<fp32>} : vector<72x16xf32>, vector<16x32xf32>, vector<72x32xf32> -> vector<72x32xf32>
    %c0_20 = arith.constant 0 : index
    %c0_21 = arith.constant 0 : index
    %15 = vector.load %arg4[%c0_20, %c0_21] : memref<72x32xf32, #tpu.memory_space<vmem>>, vector<72x32xf32>
    tpu.vector_store %arg4[%c0_20, %c0_21], %14 {strides = array<i32>} : memref<72x32xf32, #tpu.memory_space<vmem>>, vector<72x32xf32>,
    return
  }
  func.func @transform_0(%arg0: i32) -> (i32, i32) {
    %c0_i32 = arith.constant 0 : i32
    %c0_i32_0 = arith.constant 0 : i32
    %c0_i32_1 = arith.constant 0 : i32
    return %c0_i32, %c0_i32_0 : i32, i32
  }
  func.func @transform_1(%arg0: i32) -> (i32, i32) {
    %c0_i32 = arith.constant 0 : i32
    %c0_i32_0 = arith.constant 0 : i32
    return %arg0, %c0_i32 : i32, i32
  }
  func.func @transform_2(%arg0: i32) -> (i32, i32) {
    %c0_i32 = arith.constant 0 : i32
    %c0_i32_0 = arith.constant 0 : i32
    %c0_i32_1 = arith.constant 0 : i32
    return %c0_i32, %c0_i32_0 : i32, i32
  }
  func.func @transform_3(%arg0: i32) -> (i32, i32) {
    %c0_i32 = arith.constant 0 : i32
    %c0_i32_0 = arith.constant 0 : i32
    return %arg0, %c0_i32 : i32, i32
  }
}

module attributes {stable_mosaic.version = 11 : i64} {
  func.func @_resize_folded_row_first(%arg0: i32, %arg1: memref<24x16xf32, #tpu.memory_space<vmem>>, %arg2: memref<48x16xf32, #tpu.memory_space<vmem>>, %arg3: memref<16x32xf32, #tpu.memory_space<vmem>>, %arg4: memref<72x32xf32, #tpu.memory_space<vmem>>, %arg5: memref<72x16xf32, #tpu.memory_space<vmem>>) attributes {dimension_semantics = [#tpu.dimension_semantics<parallel>], iteration_bounds = array<i64: 2>, scalar_prefetch = 0 : i64, scratch_operands = 1 : i64, tpu.core_type = #tpu.core_type<tc>, window_params = [{pipeline_mode = #tpu.pipeline_mode<synchronous>, transform_indices = @transform_0, window_bounds = array<i64: 24, 16>}, {transform_indices = @transform_1, window_bounds = array<i64: 48, 16>}, {pipeline_mode = #tpu.pipeline_mode<synchronous>, transform_indices = @transform_2, window_bounds = array<i64: 16, 32>}, {transform_indices = @transform_3, window_bounds = array<i64: 72, 32>}]} {
    %c0 = arith.constant 0 : index
    %c0_0 = arith.constant 0 : index
    %0 = vector.load %arg1[%c0, %c0_0] : memref<24x16xf32, #tpu.memory_space<vmem>>, vector<24x16xf32>
    %c0_1 = arith.constant 0 : index
    %c0_2 = arith.constant 0 : index
    %1 = vector.load %arg2[%c0_1, %c0_2] : memref<48x16xf32, #tpu.memory_space<vmem>>, vector<16x16xf32>
    %cst = arith.constant dense<0.000000e+00> : vector<24x16xf32>
    %2 = tpu.matmul %0, %1, %cst {dimension_numbers = #tpu.dot_dimension_numbers<[1], [0], [0], [1], [0, 0, 1, 1], [], []>, precision = #tpu.contract_precision<fp32>} : vector<24x16xf32>, vector<16x16xf32>, vector<24x16xf32> -> vector<24x16xf32>
    %c0_3 = arith.constant 0 : index
    %c0_4 = arith.constant 0 : index
    %3 = vector.load %arg5[%c0_3, %c0_4] : memref<72x16xf32, #tpu.memory_space<vmem>>, vector<24x16xf32>
    tpu.vector_store %arg5[%c0_3, %c0_4], %2 {strides = array<i32>} : memref<72x16xf32, #tpu.memory_space<vmem>>, vector<24x16xf32>,
    %c0_5 = arith.constant 0 : index
    %c0_6 = arith.constant 0 : index
    %4 = vector.load %arg1[%c0_5, %c0_6] : memref<24x16xf32, #tpu.memory_space<vmem>>, vector<24x16xf32>
    %c16 = arith.constant 16 : index
    %c0_7 = arith.constant 0 : index
    %5 = vector.load %arg2[%c16, %c0_7] : memref<48x16xf32, #tpu.memory_space<vmem>>, vector<16x16xf32>
    %cst_8 = arith.constant dense<0.000000e+00> : vector<24x16xf32>
    %6 = tpu.matmul %4, %5, %cst_8 {dimension_numbers = #tpu.dot_dimension_numbers<[1], [0], [0], [1], [0, 0, 1, 1], [], []>, precision = #tpu.contract_precision<fp32>} : vector<24x16xf32>, vector<16x16xf32>, vector<24x16xf32> -> vector<24x16xf32>
    %c24 = arith.constant 24 : index
    %c0_9 = arith.constant 0 : index
    %7 = vector.load %arg5[%c24, %c0_9] : memref<72x16xf32, #tpu.memory_space<vmem>>, vector<24x16xf32>
    tpu.vector_store %arg5[%c24, %c0_9], %6 {strides = array<i32>} : memref<72x16xf32, #tpu.memory_space<vmem>>, vector<24x16xf32>,
    %c0_10 = arith.constant 0 : index
    %c0_11 = arith.constant 0 : index
    %8 = vector.load %arg1[%c0_10, %c0_11] : memref<24x16xf32, #tpu.memory_space<vmem>>, vector<24x16xf32>
    %c32 = arith.constant 32 : index
    %c0_12 = arith.constant 0 : index
    %9 = vector.load %arg2[%c32, %c0_12] : memref<48x16xf32, #tpu.memory_space<vmem>>, vector<16x16xf32>
    %cst_13 = arith.constant dense<0.000000e+00> : vector<24x16xf32>
    %10 = tpu.matmul %8, %9, %cst_13 {dimension_numbers = #tpu.dot_dimension_numbers<[1], [0], [0], [1], [0, 0, 1, 1], [], []>, precision = #tpu.contract_precision<fp32>} : vector<24x16xf32>, vector<16x16xf32>, vector<24x16xf32> -> vector<24x16xf32>
    %c48 = arith.constant 48 : index
    %c0_14 = arith.constant 0 : index
    %11 = vector.load %arg5[%c48, %c0_14] : memref<72x16xf32, #tpu.memory_space<vmem>>, vector<24x16xf32>
    tpu.vector_store %arg5[%c48, %c0_14], %10 {strides = array<i32>} : memref<72x16xf32, #tpu.memory_space<vmem>>, vector<24x16xf32>,
    %c0_15 = arith.constant 0 : index
    %c0_16 = arith.constant 0 : index
    %12 = vector.load %arg5[%c0_15, %c0_16] : memref<72x16xf32, #tpu.memory_space<vmem>>, vector<72x16xf32>
    %c0_17 = arith.constant 0 : index
    %c0_18 = arith.constant 0 : index
    %13 = vector.load %arg3[%c0_17, %c0_18] : memref<16x32xf32, #tpu.memory_space<vmem>>, vector<16x32xf32>
    %cst_19 = arith.constant dense<0.000000e+00> : vector<72x32xf32>
    %14 = tpu.matmul %12, %13, %cst_19 {dimension_numbers = #tpu.dot_dimension_numbers<[1], [0], [0], [1], [0, 0, 1, 1], [], []>, precision = #tpu.contract_precision<fp32>} : vector<72x16xf32>, vector<16x32xf32>, vector<72x32xf32> -> vector<72x32xf32>
    %c0_20 = arith.constant 0 : index
    %c0_21 = arith.constant 0 : index
    %15 = vector.load %arg4[%c0_20, %c0_21] : memref<72x32xf32, #tpu.memory_space<vmem>>, vector<72x32xf32>
    tpu.vector_store %arg4[%c0_20, %c0_21], %14 {strides = array<i32>} : memref<72x32xf32, #tpu.memory_space<vmem>>, vector<72x32xf32>,
    return
  }
  func.func @transform_0(%arg0: i32) -> (i32, i32) {
    %c0_i32 = arith.constant 0 : i32
    %c0_i32_0 = arith.constant 0 : i32
    %c0_i32_1 = arith.constant 0 : i32
    return %c0_i32, %c0_i32_0 : i32, i32
  }
  func.func @transform_1(%arg0: i32) -> (i32, i32) {
    %c0_i32 = arith.constant 0 : i32
    %c0_i32_0 = arith.constant 0 : i32
    return %arg0, %c0_i32 : i32, i32
  }
  func.func @transform_2(%arg0: i32) -> (i32, i32) {
    %c0_i32 = arith.constant 0 : i32
    %c0_i32_0 = arith.constant 0 : i32
    %c0_i32_1 = arith.constant 0 : i32
    return %c0_i32, %c0_i32_0 : i32, i32
  }
  func.func @transform_3(%arg0: i32) -> (i32, i32) {
    %c0_i32 = arith.constant 0 : i32
    %c0_i32_0 = arith.constant 0 : i32
    return %arg0, %c0_i32 : i32, i32
  }
}

</mosaic_0001>

<bundles_post_ra>
// kernel: tpu_custom_call.1
= control target key start
LH: loop header
LB: loop body
LE: loop exit
PB: predicated region body
PF: predicated region fallthrough
CT: control target
= control target key end

     0   :  { %s3638_s12 = smov 0   ;;  %s4215_s0 = inlined_call_operand.vmem [shape: f32[24,16], index: 0, kind: input, shape index: {}]   ;;  %s4216_s1 = inlined_call_operand.vmem [shape: f32[96,16], index: 1, kind: input, shape index: {}]   ;;  %s4217_s2 = inlined_call_operand.vmem [shape: f32[16,32], index: 2, kind: input, shape index: {}]   ;;  %s4218_s3 = inlined_call_operand.vmem [shape: f32[144,32], index: 3, kind: output, shape index: {}]  }
   0x1 LB: > { %s2768_s13 = sadd.s32 4294967295, %s3613_s12   ;;  %p2772_p0 = scmp.ge.s32.totalorder %s3613_s12, 1  ;;  %s3613_s12 = sphi %s3638_s12, %s13_s12  }
   0x2   : > { %p138_p1 = scmp.lt.s32.totalorder %s3613_s12, 3 }
   0x4   : > { %p139_p2 = pnand %p2772_p0, %p138_p1 }
   0x5   : > { %s162_s14 = smul.u32 (!%p139_p2), 6, %s2768_s13  ;;  %v174_v0 = vld [vmem:[%s4215_s0] sm:$0xff] (!%p139_p2)  ;;  %vm179_vm0 = vcmask (!%p139_p2), 130048   ;;  %v3615_v1 = vmov (!%p139_p2), 0.0|0.0   ;;  %v175_v3 = vld [vmem:[%s4215_s0 + $0x8] sm:$0xff] (!%p139_p2)  ;;  %v176_v4 = vld [vmem:[%s4215_s0 + $0x10] sm:$0xff] (!%p139_p2) }
   0x6   : > { %142 = sbr.rel (%p139_p2) target bundleno = 712 (0x2c8), region = 32  ;;  %3353 = vmatprep.subr.bf16.mxu0 (!%p139_p2), %v3615_v1  ;;  %3371 = vmatprep.subr.bf16.mxu1 (!%p139_p2), %v3615_v1  ;;  %v181_v2 = vsel (!%p139_p2), %vm179_vm0, %v174_v0, 0  ;;  %vm3616_vm1 = vmmov (!%p139_p2), 0   ;;  %v3617_v5 = vmov (!%p139_p2), 0.0   ;;  %v184_v7 = vsel (!%p139_p2), %vm179_vm0, %v175_v3, 0 }
   0x7   : > { %p163_p3 = scmp.lt.s32.totalorder (!%p139_p2), %s162_s14, 11  ;;  %2937 = vmatprep.mubr.msk.f32.mxu0 (!%p139_p2), %vm3616_vm1, %v3617_v5  ;;  %v3662_v6 = vand.u32 (!%p139_p2), 4294901760, %v181_v2  ;;  %3015 = vmatprep.mubr.msk.f32.mxu1 (!%p139_p2), %vm3616_vm1, %v3617_v5  ;;  %v187_v8 = vsel (!%p139_p2), %vm179_vm0, %v176_v4, 0  ;;  %v3668_v9 = vand.u32 (!%p139_p2), 4294901760, %v184_v7  ;;  %s168_s29 = smul.u32 (!%p139_p2), 9, %s2768_s13  ;;  %vm2702_vm2 = vcmask (!%p139_p2), 261120  }
   0x8   : > { %v3670_v10 = vand.u32 (!%p139_p2), 4294901760, %v187_v8 }
   0x9   : > { %v3673_v11 = vsub.f32 (!%p139_p2), %v181_v2, %v3662_v6  ;;  %v3676_v12 = vsub.f32 (!%p139_p2), %v184_v7, %v3668_v9  ;;  %p169_p4 = scmp.lt.s32.totalorder (!%p139_p2), %s168_s29, 17 }
   0xa   : > { %v3682_v14 = vsub.f32 (!%p139_p2), %v187_v8, %v3670_v10 }
   0xb   : > { %v3679_v13 = vand.u32 (!%p139_p2), 4294901760, %v3673_v11  ;;  %v3695_v19 = vand.u32 (!%p139_p2), 4294901760, %v3676_v12 }
   0xc   : > { %v3699_v25 = vand.u32 (!%p139_p2), 4294901760, %v3682_v14 }
   0xd   : > { %s4220_s14 = smov (!%p163_p3, %s162_s14), 11  ;;  %v259_v18 = vsub.f32 %v3673_v11, %v3679_v13  ;;  %v269_v33 = vsub.f32 %v3676_v12, %v3695_v19  ;;  %s4222_s29 = smov (!%p169_p4, %s168_s29), 17 }
   0xe   : > { %s2773_s21 = sshll.u32 %s4220_s14, 3  ;;  %v279_v42 = vsub.f32 %v3682_v14, %v3699_v25  ;;  %s2774_s30 = sshll.u32 %s4222_s29, 3 }
   0xf   : > { %s3687_s24 = scalar_lea.vmem %s4216_s1, %s2773_s21  ;;  %v3713_v32 = vand.u32 4294901760, %v259_v18  ;;  %v3735_v41 = vand.u32 4294901760, %v269_v33  ;;  %s4192_s6 = scalar_lea.vmem %s4218_s3, %s2774_s30 }
  0x10   : > { %v177_v15 = vld [vmem:[%s3687_s24] sm:$0xff]  ;;  %v178_v16 = vld [vmem:[%s3687_s24 + $0x8] sm:$0xff]  ;;  %v740_v17 = vld [vmem:[%s3687_s24 + $0x10] sm:$0xff]  ;;  %v3748_v49 = vand.u32 4294901760, %v279_v42 }
  0x11   : > { %v190_v20 = vand.u32 4294901760, %v177_v15  ;;  %v193_v21 = vand.u32 4294901760, %v178_v16  ;;  %v741_v22 = vld [vmem:[%s3687_s24 + $0x18] sm:$0xff]  ;;  %v752_v23 = vand.u32 4294901760, %v740_v17  ;;  %v1302_v55 = vld [vmem:[%s3687_s24 + $0x20] sm:$0xff]  ;;  %v1303_v56 = vld [vmem:[%s3687_s24 + $0x28] sm:$0xff] }
  0x12   : > { %v755_v24 = vand.u32 4294901760, %v741_v22  ;;  %v1314_v57 = vand.u32 4294901760, %v1302_v55  ;;  %v1317_v58 = vand.u32 4294901760, %v1303_v56 }
  0x13   : > { %v3701_v26 = vpack.c.bf16 %v193_v21, %v190_v20  ;;  %v3703_v27 = vsub.f32 %v177_v15, %v190_v20  ;;  %v3705_v28 = vsub.f32 %v178_v16, %v193_v21  ;;  %v3707_v29 = vsub.f32 %v740_v17, %v752_v23 }
  0x14   : > { %v3709_v30 = vpack.c.bf16 %v755_v24, %v752_v23  ;;  %v3711_v31 = vsub.f32 %v741_v22, %v755_v24  ;;  %v1412_v59 = vsub.f32 %v1302_v55, %v1314_v57  ;;  %v1419_v60 = vsub.f32 %v1303_v56, %v1317_v58 }
  0x15   : > { %3355 = vmatpush3.bf16.msra.mxu0 %v3701_v26  ;;  %v289_v34 = vand.u32 4294901760, %v3703_v27  ;;  %v296_v35 = vand.u32 4294901760, %v3705_v28  ;;  %v851_v36 = vand.u32 4294901760, %v3707_v29  ;;  %v3360_v51 = vpack.c.bf16 %v3705_v28, %v3703_v27 }
  0x16   : > { %3373 = vmatpush3.bf16.msra.mxu1 %v3709_v30  ;;  %3356 = vmatprep.subr.bf16.mxu0 %v3615_v1  ;;  %v858_v37 = vand.u32 4294901760, %v3711_v31  ;;  %v3378_v52 = vpack.c.bf16 %v3711_v31, %v3707_v29  ;;  %v1413_v61 = vand.u32 4294901760, %v1412_v59  ;;  %v1420_v62 = vand.u32 4294901760, %v1419_v60 }
  0x17   : > { %v290_v38 = vsub.f32 %v3703_v27, %v289_v34  ;;  %v297_v39 = vsub.f32 %v3705_v28, %v296_v35  ;;  %3374 = vmatprep.subr.bf16.mxu1 %v3615_v1  ;;  %v852_v40 = vsub.f32 %v3707_v29, %v851_v36  ;;  %v3366_v53 = vpack.c.bf16 %v296_v35, %v289_v34 }
  0x18   : > { %2938 = vmatmul.mubr.f32.vlgmr.msra.gmra.mrb[0].mxu0 %v3713_v32  ;;  %v859_v43 = vsub.f32 %v3711_v31, %v858_v37  ;;  %v3384_v54 = vpack.c.bf16 %v858_v37, %v851_v36  ;;  %v3390_v63 = vpack.c.bf16 %v1317_v58, %v1314_v57  ;;  %v1414_v0 = vsub.f32 %v1412_v59, %v1413_v61 }
  0x19   : > { %3016 = vmatmul.mubr.f32.vlgmr.msra.gmra.mrb[0].mxu1 %v3713_v32  ;;  %2940 = vmatprep.mubr.msk.f32.mxu0 %vm3616_vm1, %v3617_v5  ;;  %v291_v44 = vand.u32 4294901760, %v290_v38  ;;  %v298_v45 = vand.u32 4294901760, %v297_v39  ;;  %v853_v46 = vand.u32 4294901760, %v852_v40  ;;  %v1421_v2 = vsub.f32 %v1419_v60, %v1420_v62 }
  0x1a   : > { %3018 = vmatprep.mubr.msk.f32.mxu1 %vm3616_vm1, %v3617_v5  ;;  %v860_v47 = vand.u32 4294901760, %v859_v43  ;;  %v1415_v3 = vand.u32 4294901760, %v1414_v0  ;;  %v3396_v8 = vpack.c.bf16 %v1419_v60, %v1412_v59  ;;  %v3402_v15 = vpack.c.bf16 %v1420_v62, %v1413_v61 }
  0x1b   : > { %v3357_v48 = vpack.c.bf16 %v298_v45, %v291_v44  ;;  %v1422_v4 = vand.u32 4294901760, %v1421_v2 }
  0x1c   : > { %2941 = vmatmul.mubr.f32.gmra.mrb[2].mxu0 %v3735_v41  ;;  %v3375_v50 = vpack.c.bf16 %v860_v47, %v853_v46 }
  0x1d   : > { %3358 = vmatpush3.bf16.msra.mxu0 %v3357_v48  ;;  %3019 = vmatmul.mubr.f32.gmra.mrb[2].mxu1 %v3735_v41  ;;  %v3393_v7 = vpack.c.bf16 %v1422_v4, %v1415_v3 }
  0x1e   : > { %2943 = vmatprep.mubr.msk.f32.mxu0 %vm3616_vm1, %v3617_v5  ;;  %3021 = vmatprep.mubr.msk.f32.mxu1 %vm3616_vm1, %v3617_v5 }
  0x1f   : > { %3376 = vmatpush3.bf16.msra.mxu1 %v3375_v50  ;;  %3359 = vmatprep.subr.bf16.mxu0 %v3615_v1 }
  0x20   : > { %2944 = vmatmul.mubr.f32.gmra.mrb[4].mxu0 %v3748_v49  ;;  %3377 = vmatprep.subr.bf16.mxu1 %v3615_v1 }
  0x21   : > { %3022 = vmatmul.mubr.f32.gmra.mrb[4].mxu1 %v3748_v49  ;;  %2950 = vmatprep.mubr.msk.f32.mxu0 %vm3616_vm1, %v3617_v5 }
  0x22   : > { %3028 = vmatprep.mubr.msk.f32.mxu1 %vm3616_vm1, %v3617_v5 }
  0x24   : > { %2951 = vmatmul.mubr.f32.vlgmr.msra.gmra.mrb[0].mxu0 %v3662_v6 }
  0x25   : > { %3029 = vmatmul.mubr.f32.vlgmr.msra.gmra.mrb[0].mxu1 %v3662_v6  ;;  %2953 = vmatprep.mubr.msk.f32.mxu0 %vm3616_vm1, %v3617_v5 }
  0x26   : > { %3031 = vmatprep.mubr.msk.f32.mxu1 %vm3616_vm1, %v3617_v5  ;;  %3361 = vmatpush3.bf16.msra.mxu0 %v3360_v51 }
  0x27   : > { %3379 = vmatpush3.bf16.msra.mxu1 %v3378_v52  ;;  %3362 = vmatprep.subr.bf16.mxu0 %v3615_v1 }
  0x28   : > { %2954 = vmatmul.mubr.f32.gmra.mrb[2].mxu0 %v3668_v9  ;;  %3380 = vmatprep.subr.bf16.mxu1 %v3615_v1 }
  0x29   : > { %3032 = vmatmul.mubr.f32.gmra.mrb[2].mxu1 %v3668_v9  ;;  %2956 = vmatprep.mubr.msk.f32.mxu0 %vm3616_vm1, %v3617_v5 }
  0x2a   : > { %3034 = vmatprep.mubr.msk.f32.mxu1 %vm3616_vm1, %v3617_v5 }
  0x2c   : > { %2957 = vmatmul.mubr.f32.gmra.mrb[4].mxu0 %v3670_v10 }
  0x2d   : > { %3035 = vmatmul.mubr.f32.gmra.mrb[4].mxu1 %v3670_v10  ;;  %2963 = vmatprep.mubr.msk.f32.mxu0 %vm3616_vm1, %v3617_v5 }
  0x2e   : > { %3041 = vmatprep.mubr.msk.f32.mxu1 %vm3616_vm1, %v3617_v5 }
  0x30   : > { %2964 = vmatmul.mubr.f32.vlgmr.msra.gmra.mrb[0].mxu0 %v3673_v11 }
  0x31   : > { %3042 = vmatmul.mubr.f32.vlgmr.msra.gmra.mrb[0].mxu1 %v3673_v11  ;;  %2966 = vmatprep.mubr.msk.f32.mxu0 %vm3616_vm1, %v3617_v5 }
  0x32   : > { %3044 = vmatprep.mubr.msk.f32.mxu1 %vm3616_vm1, %v3617_v5  ;;  %3364 = vmatpush3.bf16.msra.mxu0 %v3701_v26 }
  0x33   : > { %3382 = vmatpush3.bf16.msra.mxu1 %v3709_v30  ;;  %3365 = vmatprep.subr.bf16.mxu0 %v3615_v1 }
  0x34   : > { %2967 = vmatmul.mubr.f32.gmra.mrb[2].mxu0 %v3676_v12  ;;  %3383 = vmatprep.subr.bf16.mxu1 %v3615_v1 }
  0x35   : > { %3045 = vmatmul.mubr.f32.gmra.mrb[2].mxu1 %v3676_v12  ;;  %2969 = vmatprep.mubr.msk.f32.mxu0 %vm3616_vm1, %v3617_v5 }
  0x36   : > { %3047 = vmatprep.mubr.msk.f32.mxu1 %vm3616_vm1, %v3617_v5 }
  0x38   : > { %2970 = vmatmul.mubr.f32.gmra.mrb[4].mxu0 %v3682_v14 }
  0x39   : > { %3048 = vmatmul.mubr.f32.gmra.mrb[4].mxu1 %v3682_v14  ;;  %2976 = vmatprep.mubr.msk.f32.mxu0 %vm3616_vm1, %v3617_v5 }
  0x3a   : > { %3054 = vmatprep.mubr.msk.f32.mxu1 %vm3616_vm1, %v3617_v5 }
  0x3c   : > { %2977 = vmatmul.mubr.f32.vlgmr.msra.gmra.mrb[0].mxu0 %v3679_v13 }
  0x3d   : > { %3055 = vmatmul.mubr.f32.vlgmr.msra.gmra.mrb[0].mxu1 %v3679_v13  ;;  %2979 = vmatprep.mubr.msk.f32.mxu0 %vm3616_vm1, %v3617_v5 }
  0x3e   : > { %3057 = vmatprep.mubr.msk.f32.mxu1 %vm3616_vm1, %v3617_v5  ;;  %3367 = vmatpush3.bf16.msra.mxu0 %v3366_v53 }
  0x3f   : > { %3385 = vmatpush3.bf16.msra.mxu1 %v3384_v54  ;;  %3368 = vmatprep.subr.bf16.mxu0 %v3615_v1 }
  0x40   : > { %2980 = vmatmul.mubr.f32.gmra.mrb[2].mxu0 %v3695_v19  ;;  %3386 = vmatprep.subr.bf16.mxu1 %v3615_v1 }
  0x41   : > { %3058 = vmatmul.mubr.f32.gmra.mrb[2].mxu1 %v3695_v19  ;;  %2982 = vmatprep.mubr.msk.f32.mxu0 %vm3616_vm1, %v3617_v5 }
  0x42   : > { %3060 = vmatprep.mubr.msk.f32.mxu1 %vm3616_vm1, %v3617_v5 }
  0x44   : > { %2983 = vmatmul.mubr.f32.gmra.mrb[4].mxu0 %v3699_v25 }
  0x45   : > { %3061 = vmatmul.mubr.f32.gmra.mrb[4].mxu1 %v3699_v25  ;;  %2989 = vmatprep.mubr.msk.f32.mxu0 %vm3616_vm1, %v3617_v5 }
  0x46   : > { %3067 = vmatprep.mubr.msk.f32.mxu1 %vm3616_vm1, %v3617_v5 }
  0x48   : > { %2990 = vmatmul.mubr.f32.vlgmr.msra.gmra.mrb[0].mxu0 %v3662_v6 }
  0x49   : > { %3068 = vmatmul.mubr.f32.vlgmr.msra.gmra.mrb[0].mxu1 %v3662_v6  ;;  %2992 = vmatprep.mubr.msk.f32.mxu0 %vm3616_vm1, %v3617_v5 }
  0x4a   : > { %3070 = vmatprep.mubr.msk.f32.mxu1 %vm3616_vm1, %v3617_v5  ;;  %3370 = vmatpush3.bf16.msra.mxu0 %v3701_v26 }
  0x4b   : > { %3388 = vmatpush3.bf16.msra.mxu1 %v3709_v30  ;;  %3389 = vmatprep.subr.bf16.mxu0 %v3615_v1 }
  0x4c   : > { %2993 = vmatmul.mubr.f32.gmra.mrb[2].mxu0 %v3668_v9  ;;  %3413 = vmatprep.subr.bf16.mxu1 %v3615_v1 }
  0x4d   : > { %3071 = vmatmul.mubr.f32.gmra.mrb[2].mxu1 %v3668_v9  ;;  %2995 = vmatprep.mubr.msk.f32.mxu0 %vm3616_vm1, %v3617_v5 }
  0x4e   : > { %3073 = vmatprep.mubr.msk.f32.mxu1 %vm3616_vm1, %v3617_v5 }
  0x50   : > { %2996 = vmatmul.mubr.f32.gmra.mrb[4].mxu0 %v3670_v10 }
  0x51   : > { %3074 = vmatmul.mubr.f32.gmra.mrb[4].mxu1 %v3670_v10  ;;  %3002 = vmatprep.mubr.msk.f32.mxu0 %vm3616_vm1, %v3617_v5 }
  0x52   : > { %3080 = vmatprep.mubr.msk.f32.mxu1 %vm3616_vm1, %v3617_v5 }
  0x54   : > { %3003 = vmatmul.mubr.f32.vlgmr.msra.gmra.mrb[0].mxu0 %v3662_v6 }
  0x55   : > { %3081 = vmatmul.mubr.f32.vlgmr.msra.gmra.mrb[0].mxu1 %v3662_v6  ;;  %3005 = vmatprep.mubr.msk.f32.mxu0 %vm3616_vm1, %v3617_v5 }
  0x56   : > { %3083 = vmatprep.mubr.msk.f32.mxu1 %vm3616_vm1, %v3617_v5  ;;  %3391 = vmatpush3.bf16.msra.mxu0 %v3390_v63 }
  0x57   : > { %3392 = vmatprep.subr.bf16.mxu0 %v3615_v1 }
  0x58   : > { %3006 = vmatmul.mubr.f32.gmra.mrb[2].mxu0 %v3668_v9 }
  0x59   : > { %3084 = vmatmul.mubr.f32.gmra.mrb[2].mxu1 %v3668_v9  ;;  %3008 = vmatprep.mubr.msk.f32.mxu0 %vm3616_vm1, %v3617_v5 }
  0x5a   : > { %3086 = vmatprep.mubr.msk.f32.mxu1 %vm3616_vm1, %v3617_v5 }
  0x5c   : > { %3009 = vmatmul.mubr.f32.gmra.mrb[4].mxu0 %v3670_v10 }
  0x5d   : > { %3087 = vmatmul.mubr.f32.gmra.mrb[4].mxu1 %v3670_v10  ;;  %3093 = vmatprep.mubr.msk.f32.mxu0 %vm3616_vm1, %v3617_v5 }
  0x5e   : > { %3233 = vmatprep.mubr.msk.f32.mxu1 %vm3616_vm1, %v3617_v5 }
  0x60   : > { %3094 = vmatmul.mubr.f32.vlgmr.msra.gmra.mrb[6].mxu0 %v3713_v32 }
  0x61   : > { %3096 = vmatprep.mubr.msk.f32.mxu0 %vm3616_vm1, %v3617_v5  ;;  %3394 = vmatpush3.bf16.msra.mxu0 %v3393_v7 }
  0x62   : > { %3395 = vmatprep.subr.bf16.mxu0 %v3615_v1 }
  0x64   : > { %3097 = vmatmul.mubr.f32.gmra.mrb[8].mxu0 %v3735_v41 }
  0x65   : > { %3099 = vmatprep.mubr.msk.f32.mxu0 %vm3616_vm1, %v3617_v5 }
  0x68   : > { %3100 = vmatmul.mubr.f32.gmra.mrb[10].mxu0 %v3748_v49 }
  0x69   : > { %3106 = vmatprep.mubr.msk.f32.mxu0 %vm3616_vm1, %v3617_v5 }
  0x6c   : > { %3107 = vmatmul.mubr.f32.vlgmr.msra.gmra.mrb[6].mxu0 %v3662_v6 }
  0x6d   : > { %3109 = vmatprep.mubr.msk.f32.mxu0 %vm3616_vm1, %v3617_v5  ;;  %3397 = vmatpush3.bf16.msra.mxu0 %v3396_v8 }
  0x6e   : > { %3398 = vmatprep.subr.bf16.mxu0 %v3615_v1 }
  0x70   : > { %3110 = vmatmul.mubr.f32.gmra.mrb[8].mxu0 %v3668_v9 }
  0x71   : > { %3112 = vmatprep.mubr.msk.f32.mxu0 %vm3616_vm1, %v3617_v5 }
  0x74   : > { %3113 = vmatmul.mubr.f32.gmra.mrb[10].mxu0 %v3670_v10 }
  0x75   : > { %3119 = vmatprep.mubr.msk.f32.mxu0 %vm3616_vm1, %v3617_v5 }
  0x78   : > { %3120 = vmatmul.mubr.f32.vlgmr.msra.gmra.mrb[6].mxu0 %v3673_v11  ;;  %v1870_v11 = vld [vmem:[%s4217_s2] sm:$0xff] }
  0x79   : > { %3122 = vmatprep.mubr.msk.f32.mxu0 %vm3616_vm1, %v3617_v5  ;;  %3400 = vmatpush3.bf16.msra.mxu0 %v3390_v63 }
  0x7a   : > { %3401 = vmatprep.subr.bf16.mxu0 %v3615_v1 }
  0x7c   : > { %3123 = vmatmul.mubr.f32.gmra.mrb[8].mxu0 %v3676_v12  ;;  %v1900_v12 = vand.u32 4294901760, %v1870_v11 }
  0x7d   : > { %3125 = vmatprep.mubr.msk.f32.mxu0 %vm3616_vm1, %v3617_v5 }
  0x80   : > { %3126 = vmatmul.mubr.f32.gmra.mrb[10].mxu0 %v3682_v14  ;;  %v2058_v14 = vsub.f32 %v1870_v11, %v1900_v12 }
  0x81   : > { %3132 = vmatprep.mubr.msk.f32.mxu0 %vm3616_vm1, %v3617_v5 }
  0x82   : > { %v2059_v17 = vand.u32 4294901760, %v2058_v14 }
  0x84   : > { %3133 = vmatmul.mubr.f32.vlgmr.msra.gmra.mrb[6].mxu0 %v3679_v13  ;;  %v2060_v34 = vsub.f32 %v2058_v14, %v2059_v17 }
  0x85   : > { %3135 = vmatprep.mubr.msk.f32.mxu0 %vm3616_vm1, %v3617_v5  ;;  %3403 = vmatpush3.bf16.msra.mxu0 %v3402_v15 }
  0x86   : > { %3404 = vmatprep.subr.bf16.mxu0 %v3615_v1  ;;  %v2061_v44 = vand.u32 4294901760, %v2060_v34 }
  0x88   : > { %3136 = vmatmul.mubr.f32.gmra.mrb[8].mxu0 %v3695_v19 }
  0x89   : > { %3138 = vmatprep.mubr.msk.f32.mxu0 %vm3616_vm1, %v3617_v5 }
  0x8c   : > { %3139 = vmatmul.mubr.f32.gmra.mrb[10].mxu0 %v3699_v25 }
  0x8d   : > { %3145 = vmatprep.mubr.msk.f32.mxu0 %vm3616_vm1, %v3617_v5 }
  0x90   : > { %3146 = vmatmul.mubr.f32.vlgmr.msra.gmra.mrb[6].mxu0 %v3662_v6 }
  0x91   : > { %3148 = vmatprep.mubr.msk.f32.mxu0 %vm3616_vm1, %v3617_v5  ;;  %3406 = vmatpush3.bf16.msra.mxu0 %v3390_v63 }
  0x92   : > { %3407 = vmatprep.subr.bf16.mxu0 %v3615_v1 }
  0x94   : > { %3149 = vmatmul.mubr.f32.gmra.mrb[8].mxu0 %v3668_v9 }
  0x95   : > { %3151 = vmatprep.mubr.msk.f32.mxu0 %vm3616_vm1, %v3617_v5 }
  0x98   : > { %3152 = vmatmul.mubr.f32.gmra.mrb[10].mxu0 %v3670_v10 }
  0x99   : > { %3158 = vmatprep.mubr.msk.f32.mxu0 %vm3616_vm1, %v3617_v5 }
  0x9c   : > { %3159 = vmatmul.mubr.f32.vlgmr.msra.gmra.mrb[6].mxu0 %v3662_v6  ;;  %v1871_v6 = vld [vmem:[%s4217_s2 + $0x8] sm:$0xff] }
  0x9d   : > { %3161 = vmatprep.mubr.msk.f32.mxu0 %vm3616_vm1, %v3617_v5  ;;  %v1903_v13 = vand.u32 4294901760, %v1871_v6 }
  0xa0   : > { %3162 = vmatmul.mubr.f32.gmra.mrb[8].mxu0 %v3668_v9  ;;  %v2065_v9 = vsub.f32 %v1871_v6, %v1903_v13 }
  0xa1   : > { %3164 = vmatprep.mubr.msk.f32.mxu0 %vm3616_vm1, %v3617_v5 }
  0xa2   : > { %v3414_v16 = vpack.c.bf16 %v2065_v9, %v2058_v14  ;;  %v2066_v18 = vand.u32 4294901760, %v2065_v9 }
  0xa4   : > { %3165 = vmatmul.mubr.f32.gmra.mrb[10].mxu0 %v3670_v10  ;;  %3415 = vmatpush3.bf16.msra.mxu1 %v3414_v16  ;;  %v3946_v10 = vpack.c.bf16 %v1903_v13, %v1900_v12  ;;  %v3950_v19 = vpack.c.bf16 %v2066_v18, %v2059_v17  ;;  %v2067_v35 = vsub.f32 %v2065_v9, %v2066_v18 }
  0xa5   : > { %3171 = vmatprep.mubr.msk.f32.mxu0 %vm3616_vm1, %v3617_v5  ;;  %3416 = vmatprep.subr.bf16.mxu1 %v3615_v1 }
  0xa6   : > { %3409 = vmatpush3.bf16.msra.mxu0 %v3946_v10  ;;  %v2068_v45 = vand.u32 4294901760, %v2067_v35 }
  0xa7   : > { %3410 = vmatprep.subr.bf16.mxu0 %v3615_v1 }
  0xa8   : > { %v3411_v55 = vpack.c.bf16 %v2068_v45, %v2061_v44 }
 0x127   : > { %v718_v20 = vpop.f32.mrb[0].mxu0 }
 0x128   : > { %734 = vst.msk [vmem:[#allocation2] sm:$0xff] %vm179_vm0, %v718_v20  ;;  %v3004_v21 = vpop.f32.mrb[1].mxu0  ;;  %v1280_v22 = vpop.f32.mrb[0].mxu1 }
 0x129   : > { %1296 = vst.msk [vmem:[#allocation2 + $0x18] sm:$0xff] %vm179_vm0, %v1280_v22  ;;  %v3082_v23 = vpop.f32.mrb[1].mxu1 }
 0x12b   : > { %v724_v24 = vpop.f32.mrb[2].mxu0 }
 0x12c   : > { %735 = vst.msk [vmem:[#allocation2 + $0x8] sm:$0xff] %vm179_vm0, %v724_v24  ;;  %v3007_v25 = vpop.f32.mrb[3].mxu0  ;;  %v1286_v26 = vpop.f32.mrb[2].mxu1 }
 0x12d   : > { %1297 = vst.msk [vmem:[#allocation2 + $0x20] sm:$0xff] %vm179_vm0, %v1286_v26  ;;  %v3085_v27 = vpop.f32.mrb[3].mxu1 }
 0x12f   : > { %v730_v28 = vpop.f32.mrb[4].mxu0  ;;  %v1861_v29 = vld [vmem:[#allocation2] sm:$0xff] }
 0x130   : > { %736 = vst.msk [vmem:[#allocation2 + $0x10] sm:$0xff] %vm179_vm0, %v730_v28  ;;  %v3010_v30 = vpop.f32.mrb[5].mxu0  ;;  %v1292_v31 = vpop.f32.mrb[4].mxu1  ;;  %v1873_v32 = vsel %vm179_vm0, %v1861_v29, 0  ;;  %v1864_v33 = vld [vmem:[#allocation2 + $0x18] sm:$0xff] }
 0x131   : > { %1298 = vst.msk [vmem:[#allocation2 + $0x28] sm:$0xff] %vm179_vm0, %v1292_v31  ;;  %v3088_v36 = vpop.f32.mrb[5].mxu1  ;;  %v3959_v37 = vand.u32 4294901760, %v1873_v32  ;;  %v1882_v38 = vsel %vm179_vm0, %v1864_v33, 0 }
 0x132   : > { %v3966_v42 = vand.u32 4294901760, %v1882_v38 }
 0x133   : > { %v3963_v39 = vsub.f32 %v1873_v32, %v3959_v37  ;;  %v1862_v40 = vld [vmem:[#allocation2 + $0x8] sm:$0xff] }
 0x134   : > { %v1876_v41 = vsel %vm179_vm0, %v1862_v40, 0  ;;  %v1865_v43 = vld [vmem:[#allocation2 + $0x20] sm:$0xff]  ;;  %v3985_v53 = vsub.f32 %v1882_v38, %v3966_v42 }
 0x135   : > { %3234 = vmatmul.mubr.f32.vlgmr.msra.gmra.mrb[6].mxu1 %v3963_v39  ;;  %v3969_v46 = vand.u32 4294901760, %v1876_v41  ;;  %v1968_v47 = vand.u32 4294901760, %v3963_v39  ;;  %v1885_v48 = vsel %vm179_vm0, %v1865_v43, 0 }
 0x136   : > { %3236 = vmatprep.mubr.msk.f32.mxu1 %vm3616_vm1, %v3617_v5  ;;  %3418 = vmatpush3.bf16.msra.mxu1 %v3946_v10  ;;  %v3991_v59 = vand.u32 4294901760, %v1885_v48  ;;  %v1998_v63 = vand.u32 4294901760, %v3985_v53 }
 0x137   : > { %v3977_v49 = vsub.f32 %v1876_v41, %v3969_v46  ;;  %v1969_v50 = vsub.f32 %v3963_v39, %v1968_v47  ;;  %v1863_v51 = vld [vmem:[#allocation2 + $0x10] sm:$0xff]  ;;  %3419 = vmatprep.subr.bf16.mxu1 %v3615_v1 }
 0x138   : > { %v1879_v52 = vsel %vm179_vm0, %v1863_v51, 0  ;;  %v1866_v54 = vld [vmem:[#allocation2 + $0x28] sm:$0xff]  ;;  %v4008_v3 = vsub.f32 %v1885_v48, %v3991_v59  ;;  %v1999_v15 = vsub.f32 %v3985_v53, %v1998_v63 }
 0x139   : > { %3237 = vmatmul.mubr.f32.gmra.mrb[8].mxu1 %v3977_v49  ;;  %v1970_v56 = vand.u32 4294901760, %v1969_v50  ;;  %v3988_v57 = vand.u32 4294901760, %v1879_v52  ;;  %v1978_v58 = vand.u32 4294901760, %v3977_v49  ;;  %v1888_v60 = vsel %vm179_vm0, %v1866_v54, 0 }
 0x13a   : > { %3239 = vmatprep.mubr.msk.f32.mxu1 %vm3616_vm1, %v3617_v5  ;;  %v4010_v4 = vand.u32 4294901760, %v1888_v60  ;;  %v2008_v6 = vand.u32 4294901760, %v4008_v3  ;;  %v2000_v12 = vand.u32 4294901760, %v1999_v15 }
 0x13b   : > { %3172 = vmatmul.mubr.f32.vlgmr.msra.gmra.mrb[12].mxu0 %v1970_v56  ;;  %v3997_v61 = vsub.f32 %v1879_v52, %v3988_v57  ;;  %v1979_v62 = vsub.f32 %v3977_v49, %v1978_v58 }
 0x13c   : > { %3174 = vmatprep.mubr.msk.f32.mxu0 %vm3616_vm1, %v3617_v5  ;;  %3412 = vmatpush3.bf16.msra.mxu0 %v3411_v55  ;;  %v4024_v11 = vsub.f32 %v1888_v60, %v4010_v4  ;;  %v2009_v13 = vsub.f32 %v4008_v3, %v2008_v6 }
 0x13d   : > { %3240 = vmatmul.mubr.f32.gmra.mrb[10].mxu1 %v3997_v61  ;;  %v1980_v0 = vand.u32 4294901760, %v1979_v62  ;;  %v1988_v2 = vand.u32 4294901760, %v3997_v61 }
 0x13e   : > { %3242 = vmatprep.mubr.msk.f32.mxu1 %vm3616_vm1, %v3617_v5  ;;  %v2018_v14 = vand.u32 4294901760, %v4024_v11  ;;  %v2010_v9 = vand.u32 4294901760, %v2009_v13 }
 0x13f   : > { %3175 = vmatmul.mubr.f32.gmra.mrb[14].mxu0 %v1980_v0  ;;  %v1989_v7 = vsub.f32 %v3997_v61, %v1988_v2 }
 0x140   : > { %3177 = vmatprep.mubr.msk.f32.mxu0 %vm3616_vm1, %v3617_v5  ;;  %v2019_v16 = vsub.f32 %v4024_v11, %v2018_v14 }
 0x141   : > { %3243 = vmatmul.mubr.f32.gmra.mrb[12].mxu1 %v3985_v53  ;;  %v1990_v8 = vand.u32 4294901760, %v1989_v7 }
 0x142   : > { %3245 = vmatprep.mubr.msk.f32.mxu1 %vm3616_vm1, %v3617_v5  ;;  %v2020_v17 = vand.u32 4294901760, %v2019_v16 }
 0x143   : > { %3178 = vmatmul.mubr.f32.gmra.mrb[16].mxu0 %v1990_v8 }
 0x144   : > { %3180 = vmatprep.mubr.msk.f32.mxu0 %vm3616_vm1, %v3617_v5 }
 0x145   : > { %3246 = vmatmul.mubr.f32.gmra.mrb[14].mxu1 %v4008_v3 }
 0x146   : > { %3248 = vmatprep.mubr.msk.f32.mxu1 %vm3616_vm1, %v3617_v5 }
 0x147   : > { %3181 = vmatmul.mubr.f32.gmra.mrb[18].mxu0 %v2000_v12 }
 0x148   : > { %3183 = vmatprep.mubr.msk.f32.mxu0 %vm3616_vm1, %v3617_v5 }
 0x149   : > { %3249 = vmatmul.mubr.f32.gmra.mrb[16].mxu1 %v4024_v11 }
 0x14a   : > { %3251 = vmatprep.mubr.msk.f32.mxu1 %vm3616_vm1, %v3617_v5 }
 0x14b   : > { %3184 = vmatmul.mubr.f32.gmra.mrb[20].mxu0 %v2010_v9 }
 0x14c   : > { %3186 = vmatprep.mubr.msk.f32.mxu0 %vm3616_vm1, %v3617_v5 }
 0x14f   : > { %3187 = vmatmul.mubr.f32.gmra.mrb[22].mxu0 %v2020_v17 }
 0x150   : > { %3189 = vmatprep.mubr.msk.f32.mxu0 %vm3616_vm1, %v3617_v5 }
 0x16f   : > { %v1842_v18 = vpop.f32.mrb[6].mxu0 }
 0x170   : > { %1858 = vst.msk [vmem:[#allocation2 + $0x30] sm:$0xff] %vm179_vm0, %v1842_v18  ;;  %v3160_v20 = vpop.f32.mrb[7].mxu0 }
 0x173   : > { %v1848_v21 = vpop.f32.mrb[8].mxu0 }
 0x174   : > { %1859 = vst.msk [vmem:[#allocation2 + $0x38] sm:$0xff] %vm179_vm0, %v1848_v21  ;;  %v3163_v22 = vpop.f32.mrb[9].mxu0 }
 0x177   : > { %v1854_v23 = vpop.f32.mrb[10].mxu0  ;;  %v1867_v24 = vld [vmem:[#allocation2 + $0x30] sm:$0xff] }
 0x178   : > { %1860 = vst.msk [vmem:[#allocation2 + $0x40] sm:$0xff] %vm179_vm0, %v1854_v23  ;;  %v3166_v25 = vpop.f32.mrb[11].mxu0  ;;  %v1891_v26 = vsel %vm179_vm0, %v1867_v24, 0 }
 0x179   : > { %v4054_v27 = vand.u32 4294901760, %v1891_v26 }
 0x17b   : > { %v2027_v28 = vsub.f32 %v1891_v26, %v4054_v27  ;;  %v1868_v29 = vld [vmem:[#allocation2 + $0x38] sm:$0xff] }
 0x17c   : > { %v1894_v30 = vsel %vm179_vm0, %v1868_v29, 0 }
 0x17d   : > { %3252 = vmatmul.mubr.f32.gmra.mrb[18].mxu1 %v2027_v28  ;;  %v4058_v31 = vand.u32 4294901760, %v1894_v30  ;;  %v2028_v32 = vand.u32 4294901760, %v2027_v28 }
 0x17e   : > { %3254 = vmatprep.mubr.msk.f32.mxu1 %vm3616_vm1, %v3617_v5 }
 0x17f   : > { %v2037_v33 = vsub.f32 %v1894_v30, %v4058_v31  ;;  %v2029_v34 = vsub.f32 %v2027_v28, %v2028_v32  ;;  %v1869_v35 = vld [vmem:[#allocation2 + $0x40] sm:$0xff] }
 0x180   : > { %v1897_v36 = vsel %vm179_vm0, %v1869_v35, 0 }
 0x181   : > { %3255 = vmatmul.mubr.f32.gmra.mrb[20].mxu1 %v2037_v33  ;;  %v2030_v38 = vand.u32 4294901760, %v2029_v34  ;;  %v4064_v40 = vand.u32 4294901760, %v1897_v36  ;;  %v2038_v41 = vand.u32 4294901760, %v2037_v33 }
 0x182   : > { %3257 = vmatprep.mubr.msk.f32.mxu1 %vm3616_vm1, %v3617_v5 }
 0x183   : > { %3190 = vmatmul.mubr.f32.gmra.mrb[24].mxu0 %v2030_v38  ;;  %v2047_v43 = vsub.f32 %v1897_v36, %v4064_v40  ;;  %v2039_v44 = vsub.f32 %v2037_v33, %v2038_v41 }
 0x184   : > { %3192 = vmatprep.mubr.msk.f32.mxu0 %vm3616_vm1, %v3617_v5 }
 0x185   : > { %3258 = vmatmul.mubr.f32.gmra.mrb[22].mxu1 %v2047_v43  ;;  %v2040_v45 = vand.u32 4294901760, %v2039_v44  ;;  %v2048_v48 = vand.u32 4294901760, %v2047_v43 }
 0x186   : > { %3264 = vmatprep.mubr.msk.f32.mxu1 %vm3616_vm1, %v3617_v5 }
 0x187   : > { %3193 = vmatmul.mubr.f32.gmra.mrb[26].mxu0 %v2040_v45  ;;  %v2049_v50 = vsub.f32 %v2047_v43, %v2048_v48 }
 0x188   : > { %3195 = vmatprep.mubr.msk.f32.mxu0 %vm3616_vm1, %v3617_v5 }
 0x189   : > { %3265 = vmatmul.mubr.f32.vlgmr.msra.gmra.mrb[6].mxu1 %v1968_v47  ;;  %v2050_v51 = vand.u32 4294901760, %v2049_v50 }
 0x18a   : > { %3267 = vmatprep.mubr.msk.f32.mxu1 %vm3616_vm1, %v3617_v5  ;;  %3421 = vmatpush3.bf16.msra.mxu1 %v3950_v19 }
 0x18b   : > { %3196 = vmatmul.mubr.f32.gmra.mrb[28].mxu0 %v2050_v51  ;;  %3422 = vmatprep.subr.bf16.mxu1 %v3615_v1 }
 0x18c   : > { %3202 = vmatprep.mubr.msk.f32.mxu0 %vm3616_vm1, %v3617_v5 }
 0x18d   : > { %3268 = vmatmul.mubr.f32.gmra.mrb[8].mxu1 %v1978_v58 }
 0x18e   : > { %3270 = vmatprep.mubr.msk.f32.mxu1 %vm3616_vm1, %v3617_v5 }
 0x18f   : > { %3203 = vmatmul.mubr.f32.vlgmr.msra.gmra.mrb[12].mxu0 %v3959_v37 }
 0x190   : > { %3205 = vmatprep.mubr.msk.f32.mxu0 %vm3616_vm1, %v3617_v5 }
 0x191   : > { %3271 = vmatmul.mubr.f32.gmra.mrb[10].mxu1 %v1988_v2 }
 0x192   : > { %3273 = vmatprep.mubr.msk.f32.mxu1 %vm3616_vm1, %v3617_v5 }
 0x193   : > { %3206 = vmatmul.mubr.f32.gmra.mrb[14].mxu0 %v3969_v46 }
 0x194   : > { %3208 = vmatprep.mubr.msk.f32.mxu0 %vm3616_vm1, %v3617_v5 }
 0x195   : > { %3274 = vmatmul.mubr.f32.gmra.mrb[12].mxu1 %v1998_v63 }
 0x196   : > { %3276 = vmatprep.mubr.msk.f32.mxu1 %vm3616_vm1, %v3617_v5 }
 0x197   : > { %3209 = vmatmul.mubr.f32.gmra.mrb[16].mxu0 %v3988_v57 }
 0x198   : > { %3211 = vmatprep.mubr.msk.f32.mxu0 %vm3616_vm1, %v3617_v5 }
 0x199   : > { %3277 = vmatmul.mubr.f32.gmra.mrb[14].mxu1 %v2008_v6 }
 0x19a   : > { %3279 = vmatprep.mubr.msk.f32.mxu1 %vm3616_vm1, %v3617_v5 }
 0x19b   : > { %3212 = vmatmul.mubr.f32.gmra.mrb[18].mxu0 %v3966_v42 }
 0x19c   : > { %3214 = vmatprep.mubr.msk.f32.mxu0 %vm3616_vm1, %v3617_v5 }
 0x19d   : > { %3280 = vmatmul.mubr.f32.gmra.mrb[16].mxu1 %v2018_v14 }
 0x19e   : > { %3282 = vmatprep.mubr.msk.f32.mxu1 %vm3616_vm1, %v3617_v5 }
 0x19f   : > { %3215 = vmatmul.mubr.f32.gmra.mrb[20].mxu0 %v3991_v59 }
 0x1a0   : > { %3217 = vmatprep.mubr.msk.f32.mxu0 %vm3616_vm1, %v3617_v5 }
 0x1a1   : > { %3283 = vmatmul.mubr.f32.gmra.mrb[18].mxu1 %v2028_v32 }
 0x1a2   : > { %3285 = vmatprep.mubr.msk.f32.mxu1 %vm3616_vm1, %v3617_v5 }
 0x1a3   : > { %3218 = vmatmul.mubr.f32.gmra.mrb[22].mxu0 %v4010_v4 }
 0x1a4   : > { %3220 = vmatprep.mubr.msk.f32.mxu0 %vm3616_vm1, %v3617_v5 }
 0x1a5   : > { %3286 = vmatmul.mubr.f32.gmra.mrb[20].mxu1 %v2038_v41 }
 0x1a6   : > { %3288 = vmatprep.mubr.msk.f32.mxu1 %vm3616_vm1, %v3617_v5 }
 0x1a7   : > { %3221 = vmatmul.mubr.f32.gmra.mrb[24].mxu0 %v4054_v27 }
 0x1a8   : > { %3223 = vmatprep.mubr.msk.f32.mxu0 %vm3616_vm1, %v3617_v5 }
 0x1a9   : > { %3289 = vmatmul.mubr.f32.gmra.mrb[22].mxu1 %v2048_v48 }
 0x1aa   : > { %3295 = vmatprep.mubr.msk.f32.mxu1 %vm3616_vm1, %v3617_v5 }
 0x1ab   : > { %3224 = vmatmul.mubr.f32.gmra.mrb[26].mxu0 %v4058_v31 }
 0x1ac   : > { %3226 = vmatprep.mubr.msk.f32.mxu0 %vm3616_vm1, %v3617_v5 }
 0x1ad   : > { %3296 = vmatmul.mubr.f32.vlgmr.msra.gmra.mrb[6].mxu1 %v3959_v37 }
 0x1ae   : > { %3298 = vmatprep.mubr.msk.f32.mxu1 %vm3616_vm1, %v3617_v5  ;;  %3424 = vmatpush3.bf16.msra.mxu1 %v3946_v10 }
 0x1af   : > { %3227 = vmatmul.mubr.f32.gmra.mrb[28].mxu0 %v4064_v40 }
 0x1b1   : > { %3299 = vmatmul.mubr.f32.gmra.mrb[8].mxu1 %v3969_v46 }
 0x1b2   : > { %3301 = vmatprep.mubr.msk.f32.mxu1 %vm3616_vm1, %v3617_v5 }
 0x1b5   : > { %3302 = vmatmul.mubr.f32.gmra.mrb[10].mxu1 %v3988_v57 }
 0x1b6   : > { %3304 = vmatprep.mubr.msk.f32.mxu1 %vm3616_vm1, %v3617_v5 }
 0x1b9   : > { %3305 = vmatmul.mubr.f32.gmra.mrb[12].mxu1 %v3966_v42 }
 0x1ba   : > { %3307 = vmatprep.mubr.msk.f32.mxu1 %vm3616_vm1, %v3617_v5 }
 0x1bd   : > { %3308 = vmatmul.mubr.f32.gmra.mrb[14].mxu1 %v3991_v59 }
 0x1be   : > { %3310 = vmatprep.mubr.msk.f32.mxu1 %vm3616_vm1, %v3617_v5 }
 0x1c1   : > { %3311 = vmatmul.mubr.f32.gmra.mrb[16].mxu1 %v4010_v4 }
 0x1c2   : > { %3313 = vmatprep.mubr.msk.f32.mxu1 %vm3616_vm1, %v3617_v5 }
 0x1c5   : > { %3314 = vmatmul.mubr.f32.gmra.mrb[18].mxu1 %v4054_v27 }
 0x1c6   : > { %3316 = vmatprep.mubr.msk.f32.mxu1 %vm3616_vm1, %v3617_v5 }
 0x1c9   : > { %3317 = vmatmul.mubr.f32.gmra.mrb[20].mxu1 %v4058_v31 }
 0x1ca   : > { %3319 = vmatprep.mubr.msk.f32.mxu1 %vm3616_vm1, %v3617_v5 }
 0x1cd   : > { %3320 = vmatmul.mubr.f32.gmra.mrb[22].mxu1 %v4064_v40 }
 0x1ce   : > { %3326 = vmatprep.mubr.msk.f32.mxu1 %vm3616_vm1, %v3617_v5 }
 0x1d1   : > { %3327 = vmatmul.mubr.f32.vlgmr.msra.gmra.mrb[6].mxu1 %v3959_v37 }
 0x1d2   : > { %3329 = vmatprep.mubr.msk.f32.mxu1 %vm3616_vm1, %v3617_v5 }
 0x1d5   : > { %3330 = vmatmul.mubr.f32.gmra.mrb[8].mxu1 %v3969_v46 }
 0x1d6   : > { %3332 = vmatprep.mubr.msk.f32.mxu1 %vm3616_vm1, %v3617_v5 }
 0x1d9   : > { %3333 = vmatmul.mubr.f32.gmra.mrb[10].mxu1 %v3988_v57 }
 0x1da   : > { %3335 = vmatprep.mubr.msk.f32.mxu1 %vm3616_vm1, %v3617_v5 }
 0x1dd   : > { %3336 = vmatmul.mubr.f32.gmra.mrb[12].mxu1 %v3966_v42 }
 0x1de   : > { %3338 = vmatprep.mubr.msk.f32.mxu1 %vm3616_vm1, %v3617_v5 }
 0x1e1   : > { %3339 = vmatmul.mubr.f32.gmra.mrb[14].mxu1 %v3991_v59 }
 0x1e2   : > { %3341 = vmatprep.mubr.msk.f32.mxu1 %vm3616_vm1, %v3617_v5 }
 0x1e5   : > { %3342 = vmatmul.mubr.f32.gmra.mrb[16].mxu1 %v4010_v4 }
 0x1e6   : > { %3344 = vmatprep.mubr.msk.f32.mxu1 %vm3616_vm1, %v3617_v5 }
 0x1e9   : > { %3345 = vmatmul.mubr.f32.gmra.mrb[18].mxu1 %v4054_v27 }
 0x1ea   : > { %3347 = vmatprep.mubr.msk.f32.mxu1 %vm3616_vm1, %v3617_v5 }
 0x1ed   : > { %3348 = vmatmul.mubr.f32.gmra.mrb[20].mxu1 %v4058_v31 }
 0x1ee   : > { %3350 = vmatprep.mubr.msk.f32.mxu1 %vm3616_vm1, %v3617_v5 }
 0x1f1   : > { %3351 = vmatmul.mubr.f32.gmra.mrb[22].mxu1 %v4064_v40 }
 0x262   : > { %v2133_v1 = vpop.f32.mrb[12].mxu0 }
 0x263   : > { %v3204_v10 = vpop.f32.mrb[13].mxu0 }
 0x266   : > { %v2139_v19 = vpop.f32.mrb[14].mxu0 }
 0x267   : > { %v3207_v37 = vpop.f32.mrb[15].mxu0 }
 0x26a   : > { %v2145_v39 = vpop.f32.mrb[16].mxu0 }
 0x26b   : > { %v3210_v42 = vpop.f32.mrb[17].mxu0 }
 0x26e   : > { %v2151_v46 = vpop.f32.mrb[18].mxu0 }
 0x26f   : > { %v3213_v47 = vpop.f32.mrb[19].mxu0 }
 0x272   : > { %v2157_v49 = vpop.f32.mrb[20].mxu0 }
 0x273   : > { %v3216_v52 = vpop.f32.mrb[21].mxu0 }
 0x276   : > { %v2163_v53 = vpop.f32.mrb[22].mxu0 }
 0x277   : > { %v3219_v54 = vpop.f32.mrb[23].mxu0 }
 0x27a   : > { %v2169_v55 = vpop.f32.mrb[24].mxu0 }
 0x27b   : > { %v3222_v56 = vpop.f32.mrb[25].mxu0 }
 0x27e   : > { %v2175_v57 = vpop.f32.mrb[26].mxu0 }
 0x27f   : > { %v3225_v58 = vpop.f32.mrb[27].mxu0 }
 0x282   : > { %v2181_v5 = vpop.f32.mrb[28].mxu0 }
 0x283   : > { %v3228_v59 = vpop.f32.mrb[29].mxu0 }
 0x2a4   : > { %v2650_v60 = vpop.f32.mrb[6].mxu1 }
 0x2a5   : > { %v3425_v61 = vadd.f32 %v2650_v60, %v2133_v1  ;;  %v3328_v62 = vpop.f32.mrb[7].mxu1 }
 0x2a7   : > { %2703 = vst.msk [vmem:[%s4192_s6] sm:$0xff] %vm2702_vm2, %v3425_v61 }
 0x2a8   : > { %v2656_v63 = vpop.f32.mrb[8].mxu1 }
 0x2a9   : > { %v3426_v0 = vadd.f32 %v2656_v63, %v2139_v19  ;;  %v3331_v2 = vpop.f32.mrb[9].mxu1 }
 0x2ab   : > { %2704 = vst.msk [vmem:[%s4192_s6 + $0x8] sm:$0xff] %vm2702_vm2, %v3426_v0 }
 0x2ac   : > { %v2662_v3 = vpop.f32.mrb[10].mxu1 }
 0x2ad   : > { %v3427_v4 = vadd.f32 %v2662_v3, %v2145_v39  ;;  %v3334_v7 = vpop.f32.mrb[11].mxu1 }
 0x2af   : > { %2705 = vst.msk [vmem:[%s4192_s6 + $0x10] sm:$0xff] %vm2702_vm2, %v3427_v4 }
 0x2b0   : > { %v2668_v8 = vpop.f32.mrb[12].mxu1 }
 0x2b1   : > { %v3428_v15 = vadd.f32 %v2668_v8, %v2151_v46  ;;  %v3337_v11 = vpop.f32.mrb[13].mxu1 }
 0x2b3   : > { %2706 = vst.msk [vmem:[%s4192_s6 + $0x18] sm:$0xff] %vm2702_vm2, %v3428_v15 }
 0x2b4   : > { %v2674_v6 = vpop.f32.mrb[14].mxu1 }
 0x2b5   : > { %v3429_v12 = vadd.f32 %v2674_v6, %v2157_v49  ;;  %v3340_v13 = vpop.f32.mrb[15].mxu1 }
 0x2b7   : > { %2707 = vst.msk [vmem:[%s4192_s6 + $0x20] sm:$0xff] %vm2702_vm2, %v3429_v12 }
 0x2b8   : > { %v2680_v14 = vpop.f32.mrb[16].mxu1 }
 0x2b9   : > { %v3430_v9 = vadd.f32 %v2680_v14, %v2163_v53  ;;  %v3343_v16 = vpop.f32.mrb[17].mxu1 }
 0x2bb   : > { %2708 = vst.msk [vmem:[%s4192_s6 + $0x28] sm:$0xff] %vm2702_vm2, %v3430_v9 }
 0x2bc   : > { %v2686_v17 = vpop.f32.mrb[18].mxu1 }
 0x2bd   : > { %v3431_v18 = vadd.f32 %v2686_v17, %v2169_v55  ;;  %v3346_v20 = vpop.f32.mrb[19].mxu1 }
 0x2bf   : > { %2709 = vst.msk [vmem:[%s4192_s6 + $0x30] sm:$0xff] %vm2702_vm2, %v3431_v18 }
 0x2c0   : > { %v2692_v21 = vpop.f32.mrb[20].mxu1 }
 0x2c1   : > { %v3432_v22 = vadd.f32 %v2692_v21, %v2175_v57  ;;  %v3349_v23 = vpop.f32.mrb[21].mxu1 }
 0x2c3   : > { %2710 = vst.msk [vmem:[%s4192_s6 + $0x38] sm:$0xff] %vm2702_vm2, %v3432_v22 }
 0x2c4   : > { %v2698_v24 = vpop.f32.mrb[22].mxu1 }
 0x2c5   : > { %v3433_v25 = vadd.f32 %v2698_v24, %v2181_v5  ;;  %v3352_v26 = vpop.f32.mrb[23].mxu1 }
 0x2c7   : > { %2711 = vst.msk [vmem:[%s4192_s6 + $0x40] sm:$0xff] %vm2702_vm2, %v3433_v25 }
 0x2c8 PF: > { %s13_s12 = sadd.s32 1, %s3613_s12  }
 0x2c9   : > { %p10_p5 = scmp.ge.s32.totalorder %s13_s12, 4  }
 0x2cb   :  { %12 = sbr.rel (!%p10_p5) target bundleno = 1 (0x1), region = 62 }

// kernel: tpu_custom_call.1
= control target key start
LH: loop header
LB: loop body
LE: loop exit
PB: predicated region body
PF: predicated region fallthrough
CT: control target
= control target key end

     0   :  { %s3638_s12 = smov 0   ;;  %s4215_s0 = inlined_call_operand.vmem [shape: f32[24,16], index: 0, kind: input, shape index: {}]   ;;  %s4216_s1 = inlined_call_operand.vmem [shape: f32[96,16], index: 1, kind: input, shape index: {}]   ;;  %s4217_s2 = inlined_call_operand.vmem [shape: f32[16,32], index: 2, kind: input, shape index: {}]   ;;  %s4218_s3 = inlined_call_operand.vmem [shape: f32[144,32], index: 3, kind: output, shape index: {}]  }
   0x1 LB: > { %s2768_s13 = sadd.s32 4294967295, %s3613_s12   ;;  %p2772_p0 = scmp.ge.s32.totalorder %s3613_s12, 1  ;;  %s3613_s12 = sphi %s3638_s12, %s13_s12  }
   0x2   : > { %p138_p1 = scmp.lt.s32.totalorder %s3613_s12, 3 }
   0x4   : > { %p139_p2 = pnand %p2772_p0, %p138_p1 }
   0x5   : > { %s162_s14 = smul.u32 (!%p139_p2), 6, %s2768_s13  ;;  %v174_v0 = vld [vmem:[%s4215_s0] sm:$0xff] (!%p139_p2)  ;;  %vm179_vm0 = vcmask (!%p139_p2), 130048   ;;  %v3615_v1 = vmov (!%p139_p2), 0.0|0.0   ;;  %v175_v3 = vld [vmem:[%s4215_s0 + $0x8] sm:$0xff] (!%p139_p2)  ;;  %v176_v4 = vld [vmem:[%s4215_s0 + $0x10] sm:$0xff] (!%p139_p2) }
   0x6   : > { %142 = sbr.rel (%p139_p2) target bundleno = 712 (0x2c8), region = 32  ;;  %3353 = vmatprep.subr.bf16.mxu0 (!%p139_p2), %v3615_v1  ;;  %3371 = vmatprep.subr.bf16.mxu1 (!%p139_p2), %v3615_v1  ;;  %v181_v2 = vsel (!%p139_p2), %vm179_vm0, %v174_v0, 0  ;;  %vm3616_vm1 = vmmov (!%p139_p2), 0   ;;  %v3617_v5 = vmov (!%p139_p2), 0.0   ;;  %v184_v7 = vsel (!%p139_p2), %vm179_vm0, %v175_v3, 0 }
   0x7   : > { %p163_p3 = scmp.lt.s32.totalorder (!%p139_p2), %s162_s14, 11  ;;  %2937 = vmatprep.mubr.msk.f32.mxu0 (!%p139_p2), %vm3616_vm1, %v3617_v5  ;;  %v3662_v6 = vand.u32 (!%p139_p2), 4294901760, %v181_v2  ;;  %3015 = vmatprep.mubr.msk.f32.mxu1 (!%p139_p2), %vm3616_vm1, %v3617_v5  ;;  %v187_v8 = vsel (!%p139_p2), %vm179_vm0, %v176_v4, 0  ;;  %v3668_v9 = vand.u32 (!%p139_p2), 4294901760, %v184_v7  ;;  %s168_s29 = smul.u32 (!%p139_p2), 9, %s2768_s13  ;;  %vm2702_vm2 = vcmask (!%p139_p2), 261120  }
   0x8   : > { %v3670_v10 = vand.u32 (!%p139_p2), 4294901760, %v187_v8 }
   0x9   : > { %v3673_v11 = vsub.f32 (!%p139_p2), %v181_v2, %v3662_v6  ;;  %v3676_v12 = vsub.f32 (!%p139_p2), %v184_v7, %v3668_v9  ;;  %p169_p4 = scmp.lt.s32.totalorder (!%p139_p2), %s168_s29, 17 }
   0xa   : > { %v3682_v14 = vsub.f32 (!%p139_p2), %v187_v8, %v3670_v10 }
   0xb   : > { %v3679_v13 = vand.u32 (!%p139_p2), 4294901760, %v3673_v11  ;;  %v3695_v19 = vand.u32 (!%p139_p2), 4294901760, %v3676_v12 }
   0xc   : > { %v3699_v25 = vand.u32 (!%p139_p2), 4294901760, %v3682_v14 }
   0xd   : > { %s4220_s14 = smov (!%p163_p3, %s162_s14), 11  ;;  %v259_v18 = vsub.f32 %v3673_v11, %v3679_v13  ;;  %v269_v33 = vsub.f32 %v3676_v12, %v3695_v19  ;;  %s4222_s29 = smov (!%p169_p4, %s168_s29), 17 }
   0xe   : > { %s2773_s21 = sshll.u32 %s4220_s14, 3  ;;  %v279_v42 = vsub.f32 %v3682_v14, %v3699_v25  ;;  %s2774_s30 = sshll.u32 %s4222_s29, 3 }
   0xf   : > { %s3687_s24 = scalar_lea.vmem %s4216_s1, %s2773_s21  ;;  %v3713_v32 = vand.u32 4294901760, %v259_v18  ;;  %v3735_v41 = vand.u32 4294901760, %v269_v33  ;;  %s4192_s6 = scalar_lea.vmem %s4218_s3, %s2774_s30 }
  0x10   : > { %v177_v15 = vld [vmem:[%s3687_s24] sm:$0xff]  ;;  %v178_v16 = vld [vmem:[%s3687_s24 + $0x8] sm:$0xff]  ;;  %v740_v17 = vld [vmem:[%s3687_s24 + $0x10] sm:$0xff]  ;;  %v3748_v49 = vand.u32 4294901760, %v279_v42 }
  0x11   : > { %v190_v20 = vand.u32 4294901760, %v177_v15  ;;  %v193_v21 = vand.u32 4294901760, %v178_v16  ;;  %v741_v22 = vld [vmem:[%s3687_s24 + $0x18] sm:$0xff]  ;;  %v752_v23 = vand.u32 4294901760, %v740_v17  ;;  %v1302_v55 = vld [vmem:[%s3687_s24 + $0x20] sm:$0xff]  ;;  %v1303_v56 = vld [vmem:[%s3687_s24 + $0x28] sm:$0xff] }
  0x12   : > { %v755_v24 = vand.u32 4294901760, %v741_v22  ;;  %v1314_v57 = vand.u32 4294901760, %v1302_v55  ;;  %v1317_v58 = vand.u32 4294901760, %v1303_v56 }
  0x13   : > { %v3701_v26 = vpack.c.bf16 %v193_v21, %v190_v20  ;;  %v3703_v27 = vsub.f32 %v177_v15, %v190_v20  ;;  %v3705_v28 = vsub.f32 %v178_v16, %v193_v21  ;;  %v3707_v29 = vsub.f32 %v740_v17, %v752_v23 }
  0x14   : > { %v3709_v30 = vpack.c.bf16 %v755_v24, %v752_v23  ;;  %v3711_v31 = vsub.f32 %v741_v22, %v755_v24  ;;  %v1412_v59 = vsub.f32 %v1302_v55, %v1314_v57  ;;  %v1419_v60 = vsub.f32 %v1303_v56, %v1317_v58 }
  0x15   : > { %3355 = vmatpush3.bf16.msra.mxu0 %v3701_v26  ;;  %v289_v34 = vand.u32 4294901760, %v3703_v27  ;;  %v296_v35 = vand.u32 4294901760, %v3705_v28  ;;  %v851_v36 = vand.u32 4294901760, %v3707_v29  ;;  %v3360_v51 = vpack.c.bf16 %v3705_v28, %v3703_v27 }
  0x16   : > { %3373 = vmatpush3.bf16.msra.mxu1 %v3709_v30  ;;  %3356 = vmatprep.subr.bf16.mxu0 %v3615_v1  ;;  %v858_v37 = vand.u32 4294901760, %v3711_v31  ;;  %v3378_v52 = vpack.c.bf16 %v3711_v31, %v3707_v29  ;;  %v1413_v61 = vand.u32 4294901760, %v1412_v59  ;;  %v1420_v62 = vand.u32 4294901760, %v1419_v60 }
  0x17   : > { %v290_v38 = vsub.f32 %v3703_v27, %v289_v34  ;;  %v297_v39 = vsub.f32 %v3705_v28, %v296_v35  ;;  %3374 = vmatprep.subr.bf16.mxu1 %v3615_v1  ;;  %v852_v40 = vsub.f32 %v3707_v29, %v851_v36  ;;  %v3366_v53 = vpack.c.bf16 %v296_v35, %v289_v34 }
  0x18   : > { %2938 = vmatmul.mubr.f32.vlgmr.msra.gmra.mrb[0].mxu0 %v3713_v32  ;;  %v859_v43 = vsub.f32 %v3711_v31, %v858_v37  ;;  %v3384_v54 = vpack.c.bf16 %v858_v37, %v851_v36  ;;  %v3390_v63 = vpack.c.bf16 %v1317_v58, %v1314_v57  ;;  %v1414_v0 = vsub.f32 %v1412_v59, %v1413_v61 }
  0x19   : > { %3016 = vmatmul.mubr.f32.vlgmr.msra.gmra.mrb[0].mxu1 %v3713_v32  ;;  %2940 = vmatprep.mubr.msk.f32.mxu0 %vm3616_vm1, %v3617_v5  ;;  %v291_v44 = vand.u32 4294901760, %v290_v38  ;;  %v298_v45 = vand.u32 4294901760, %v297_v39  ;;  %v853_v46 = vand.u32 4294901760, %v852_v40  ;;  %v1421_v2 = vsub.f32 %v1419_v60, %v1420_v62 }
  0x1a   : > { %3018 = vmatprep.mubr.msk.f32.mxu1 %vm3616_vm1, %v3617_v5  ;;  %v860_v47 = vand.u32 4294901760, %v859_v43  ;;  %v1415_v3 = vand.u32 4294901760, %v1414_v0  ;;  %v3396_v8 = vpack.c.bf16 %v1419_v60, %v1412_v59  ;;  %v3402_v15 = vpack.c.bf16 %v1420_v62, %v1413_v61 }
  0x1b   : > { %v3357_v48 = vpack.c.bf16 %v298_v45, %v291_v44  ;;  %v1422_v4 = vand.u32 4294901760, %v1421_v2 }
  0x1c   : > { %2941 = vmatmul.mubr.f32.gmra.mrb[2].mxu0 %v3735_v41  ;;  %v3375_v50 = vpack.c.bf16 %v860_v47, %v853_v46 }
  0x1d   : > { %3358 = vmatpush3.bf16.msra.mxu0 %v3357_v48  ;;  %3019 = vmatmul.mubr.f32.gmra.mrb[2].mxu1 %v3735_v41  ;;  %v3393_v7 = vpack.c.bf16 %v1422_v4, %v1415_v3 }
  0x1e   : > { %2943 = vmatprep.mubr.msk.f32.mxu0 %vm3616_vm1, %v3617_v5  ;;  %3021 = vmatprep.mubr.msk.f32.mxu1 %vm3616_vm1, %v3617_v5 }
  0x1f   : > { %3376 = vmatpush3.bf16.msra.mxu1 %v3375_v50  ;;  %3359 = vmatprep.subr.bf16.mxu0 %v3615_v1 }
  0x20   : > { %2944 = vmatmul.mubr.f32.gmra.mrb[4].mxu0 %v3748_v49  ;;  %3377 = vmatprep.subr.bf16.mxu1 %v3615_v1 }
  0x21   : > { %3022 = vmatmul.mubr.f32.gmra.mrb[4].mxu1 %v3748_v49  ;;  %2950 = vmatprep.mubr.msk.f32.mxu0 %vm3616_vm1, %v3617_v5 }
  0x22   : > { %3028 = vmatprep.mubr.msk.f32.mxu1 %vm3616_vm1, %v3617_v5 }
  0x24   : > { %2951 = vmatmul.mubr.f32.vlgmr.msra.gmra.mrb[0].mxu0 %v3662_v6 }
  0x25   : > { %3029 = vmatmul.mubr.f32.vlgmr.msra.gmra.mrb[0].mxu1 %v3662_v6  ;;  %2953 = vmatprep.mubr.msk.f32.mxu0 %vm3616_vm1, %v3617_v5 }
  0x26   : > { %3031 = vmatprep.mubr.msk.f32.mxu1 %vm3616_vm1, %v3617_v5  ;;  %3361 = vmatpush3.bf16.msra.mxu0 %v3360_v51 }
  0x27   : > { %3379 = vmatpush3.bf16.msra.mxu1 %v3378_v52  ;;  %3362 = vmatprep.subr.bf16.mxu0 %v3615_v1 }
  0x28   : > { %2954 = vmatmul.mubr.f32.gmra.mrb[2].mxu0 %v3668_v9  ;;  %3380 = vmatprep.subr.bf16.mxu1 %v3615_v1 }
  0x29   : > { %3032 = vmatmul.mubr.f32.gmra.mrb[2].mxu1 %v3668_v9  ;;  %2956 = vmatprep.mubr.msk.f32.mxu0 %vm3616_vm1, %v3617_v5 }
  0x2a   : > { %3034 = vmatprep.mubr.msk.f32.mxu1 %vm3616_vm1, %v3617_v5 }
  0x2c   : > { %2957 = vmatmul.mubr.f32.gmra.mrb[4].mxu0 %v3670_v10 }
  0x2d   : > { %3035 = vmatmul.mubr.f32.gmra.mrb[4].mxu1 %v3670_v10  ;;  %2963 = vmatprep.mubr.msk.f32.mxu0 %vm3616_vm1, %v3617_v5 }
  0x2e   : > { %3041 = vmatprep.mubr.msk.f32.mxu1 %vm3616_vm1, %v3617_v5 }
  0x30   : > { %2964 = vmatmul.mubr.f32.vlgmr.msra.gmra.mrb[0].mxu0 %v3673_v11 }
  0x31   : > { %3042 = vmatmul.mubr.f32.vlgmr.msra.gmra.mrb[0].mxu1 %v3673_v11  ;;  %2966 = vmatprep.mubr.msk.f32.mxu0 %vm3616_vm1, %v3617_v5 }
  0x32   : > { %3044 = vmatprep.mubr.msk.f32.mxu1 %vm3616_vm1, %v3617_v5  ;;  %3364 = vmatpush3.bf16.msra.mxu0 %v3701_v26 }
  0x33   : > { %3382 = vmatpush3.bf16.msra.mxu1 %v3709_v30  ;;  %3365 = vmatprep.subr.bf16.mxu0 %v3615_v1 }
  0x34   : > { %2967 = vmatmul.mubr.f32.gmra.mrb[2].mxu0 %v3676_v12  ;;  %3383 = vmatprep.subr.bf16.mxu1 %v3615_v1 }
  0x35   : > { %3045 = vmatmul.mubr.f32.gmra.mrb[2].mxu1 %v3676_v12  ;;  %2969 = vmatprep.mubr.msk.f32.mxu0 %vm3616_vm1, %v3617_v5 }
  0x36   : > { %3047 = vmatprep.mubr.msk.f32.mxu1 %vm3616_vm1, %v3617_v5 }
  0x38   : > { %2970 = vmatmul.mubr.f32.gmra.mrb[4].mxu0 %v3682_v14 }
  0x39   : > { %3048 = vmatmul.mubr.f32.gmra.mrb[4].mxu1 %v3682_v14  ;;  %2976 = vmatprep.mubr.msk.f32.mxu0 %vm3616_vm1, %v3617_v5 }
  0x3a   : > { %3054 = vmatprep.mubr.msk.f32.mxu1 %vm3616_vm1, %v3617_v5 }
  0x3c   : > { %2977 = vmatmul.mubr.f32.vlgmr.msra.gmra.mrb[0].mxu0 %v3679_v13 }
  0x3d   : > { %3055 = vmatmul.mubr.f32.vlgmr.msra.gmra.mrb[0].mxu1 %v3679_v13  ;;  %2979 = vmatprep.mubr.msk.f32.mxu0 %vm3616_vm1, %v3617_v5 }
  0x3e   : > { %3057 = vmatprep.mubr.msk.f32.mxu1 %vm3616_vm1, %v3617_v5  ;;  %3367 = vmatpush3.bf16.msra.mxu0 %v3366_v53 }
  0x3f   : > { %3385 = vmatpush3.bf16.msra.mxu1 %v3384_v54  ;;  %3368 = vmatprep.subr.bf16.mxu0 %v3615_v1 }
  0x40   : > { %2980 = vmatmul.mubr.f32.gmra.mrb[2].mxu0 %v3695_v19  ;;  %3386 = vmatprep.subr.bf16.mxu1 %v3615_v1 }
  0x41   : > { %3058 = vmatmul.mubr.f32.gmra.mrb[2].mxu1 %v3695_v19  ;;  %2982 = vmatprep.mubr.msk.f32.mxu0 %vm3616_vm1, %v3617_v5 }
  0x42   : > { %3060 = vmatprep.mubr.msk.f32.mxu1 %vm3616_vm1, %v3617_v5 }
  0x44   : > { %2983 = vmatmul.mubr.f32.gmra.mrb[4].mxu0 %v3699_v25 }
  0x45   : > { %3061 = vmatmul.mubr.f32.gmra.mrb[4].mxu1 %v3699_v25  ;;  %2989 = vmatprep.mubr.msk.f32.mxu0 %vm3616_vm1, %v3617_v5 }
  0x46   : > { %3067 = vmatprep.mubr.msk.f32.mxu1 %vm3616_vm1, %v3617_v5 }
  0x48   : > { %2990 = vmatmul.mubr.f32.vlgmr.msra.gmra.mrb[0].mxu0 %v3662_v6 }
  0x49   : > { %3068 = vmatmul.mubr.f32.vlgmr.msra.gmra.mrb[0].mxu1 %v3662_v6  ;;  %2992 = vmatprep.mubr.msk.f32.mxu0 %vm3616_vm1, %v3617_v5 }
  0x4a   : > { %3070 = vmatprep.mubr.msk.f32.mxu1 %vm3616_vm1, %v3617_v5  ;;  %3370 = vmatpush3.bf16.msra.mxu0 %v3701_v26 }
  0x4b   : > { %3388 = vmatpush3.bf16.msra.mxu1 %v3709_v30  ;;  %3389 = vmatprep.subr.bf16.mxu0 %v3615_v1 }
  0x4c   : > { %2993 = vmatmul.mubr.f32.gmra.mrb[2].mxu0 %v3668_v9  ;;  %3413 = vmatprep.subr.bf16.mxu1 %v3615_v1 }
  0x4d   : > { %3071 = vmatmul.mubr.f32.gmra.mrb[2].mxu1 %v3668_v9  ;;  %2995 = vmatprep.mubr.msk.f32.mxu0 %vm3616_vm1, %v3617_v5 }
  0x4e   : > { %3073 = vmatprep.mubr.msk.f32.mxu1 %vm3616_vm1, %v3617_v5 }
  0x50   : > { %2996 = vmatmul.mubr.f32.gmra.mrb[4].mxu0 %v3670_v10 }
  0x51   : > { %3074 = vmatmul.mubr.f32.gmra.mrb[4].mxu1 %v3670_v10  ;;  %3002 = vmatprep.mubr.msk.f32.mxu0 %vm3616_vm1, %v3617_v5 }
  0x52   : > { %3080 = vmatprep.mubr.msk.f32.mxu1 %vm3616_vm1, %v3617_v5 }
  0x54   : > { %3003 = vmatmul.mubr.f32.vlgmr.msra.gmra.mrb[0].mxu0 %v3662_v6 }
  0x55   : > { %3081 = vmatmul.mubr.f32.vlgmr.msra.gmra.mrb[0].mxu1 %v3662_v6  ;;  %3005 = vmatprep.mubr.msk.f32.mxu0 %vm3616_vm1, %v3617_v5 }
  0x56   : > { %3083 = vmatprep.mubr.msk.f32.mxu1 %vm3616_vm1, %v3617_v5  ;;  %3391 = vmatpush3.bf16.msra.mxu0 %v3390_v63 }
  0x57   : > { %3392 = vmatprep.subr.bf16.mxu0 %v3615_v1 }
  0x58   : > { %3006 = vmatmul.mubr.f32.gmra.mrb[2].mxu0 %v3668_v9 }
  0x59   : > { %3084 = vmatmul.mubr.f32.gmra.mrb[2].mxu1 %v3668_v9  ;;  %3008 = vmatprep.mubr.msk.f32.mxu0 %vm3616_vm1, %v3617_v5 }
  0x5a   : > { %3086 = vmatprep.mubr.msk.f32.mxu1 %vm3616_vm1, %v3617_v5 }
  0x5c   : > { %3009 = vmatmul.mubr.f32.gmra.mrb[4].mxu0 %v3670_v10 }
  0x5d   : > { %3087 = vmatmul.mubr.f32.gmra.mrb[4].mxu1 %v3670_v10  ;;  %3093 = vmatprep.mubr.msk.f32.mxu0 %vm3616_vm1, %v3617_v5 }
  0x5e   : > { %3233 = vmatprep.mubr.msk.f32.mxu1 %vm3616_vm1, %v3617_v5 }
  0x60   : > { %3094 = vmatmul.mubr.f32.vlgmr.msra.gmra.mrb[6].mxu0 %v3713_v32 }
  0x61   : > { %3096 = vmatprep.mubr.msk.f32.mxu0 %vm3616_vm1, %v3617_v5  ;;  %3394 = vmatpush3.bf16.msra.mxu0 %v3393_v7 }
  0x62   : > { %3395 = vmatprep.subr.bf16.mxu0 %v3615_v1 }
  0x64   : > { %3097 = vmatmul.mubr.f32.gmra.mrb[8].mxu0 %v3735_v41 }
  0x65   : > { %3099 = vmatprep.mubr.msk.f32.mxu0 %vm3616_vm1, %v3617_v5 }
  0x68   : > { %3100 = vmatmul.mubr.f32.gmra.mrb[10].mxu0 %v3748_v49 }
  0x69   : > { %3106 = vmatprep.mubr.msk.f32.mxu0 %vm3616_vm1, %v3617_v5 }
  0x6c   : > { %3107 = vmatmul.mubr.f32.vlgmr.msra.gmra.mrb[6].mxu0 %v3662_v6 }
  0x6d   : > { %3109 = vmatprep.mubr.msk.f32.mxu0 %vm3616_vm1, %v3617_v5  ;;  %3397 = vmatpush3.bf16.msra.mxu0 %v3396_v8 }
  0x6e   : > { %3398 = vmatprep.subr.bf16.mxu0 %v3615_v1 }
  0x70   : > { %3110 = vmatmul.mubr.f32.gmra.mrb[8].mxu0 %v3668_v9 }
  0x71   : > { %3112 = vmatprep.mubr.msk.f32.mxu0 %vm3616_vm1, %v3617_v5 }
  0x74   : > { %3113 = vmatmul.mubr.f32.gmra.mrb[10].mxu0 %v3670_v10 }
  0x75   : > { %3119 = vmatprep.mubr.msk.f32.mxu0 %vm3616_vm1, %v3617_v5 }
  0x78   : > { %3120 = vmatmul.mubr.f32.vlgmr.msra.gmra.mrb[6].mxu0 %v3673_v11  ;;  %v1870_v11 = vld [vmem:[%s4217_s2] sm:$0xff] }
  0x79   : > { %3122 = vmatprep.mubr.msk.f32.mxu0 %vm3616_vm1, %v3617_v5  ;;  %3400 = vmatpush3.bf16.msra.mxu0 %v3390_v63 }
  0x7a   : > { %3401 = vmatprep.subr.bf16.mxu0 %v3615_v1 }
  0x7c   : > { %3123 = vmatmul.mubr.f32.gmra.mrb[8].mxu0 %v3676_v12  ;;  %v1900_v12 = vand.u32 4294901760, %v1870_v11 }
  0x7d   : > { %3125 = vmatprep.mubr.msk.f32.mxu0 %vm3616_vm1, %v3617_v5 }
  0x80   : > { %3126 = vmatmul.mubr.f32.gmra.mrb[10].mxu0 %v3682_v14  ;;  %v2058_v14 = vsub.f32 %v1870_v11, %v1900_v12 }
  0x81   : > { %3132 = vmatprep.mubr.msk.f32.mxu0 %vm3616_vm1, %v3617_v5 }
  0x82   : > { %v2059_v17 = vand.u32 4294901760, %v2058_v14 }
  0x84   : > { %3133 = vmatmul.mubr.f32.vlgmr.msra.gmra.mrb[6].mxu0 %v3679_v13  ;;  %v2060_v34 = vsub.f32 %v2058_v14, %v2059_v17 }
  0x85   : > { %3135 = vmatprep.mubr.msk.f32.mxu0 %vm3616_vm1, %v3617_v5  ;;  %3403 = vmatpush3.bf16.msra.mxu0 %v3402_v15 }
  0x86   : > { %3404 = vmatprep.subr.bf16.mxu0 %v3615_v1  ;;  %v2061_v44 = vand.u32 4294901760, %v2060_v34 }
  0x88   : > { %3136 = vmatmul.mubr.f32.gmra.mrb[8].mxu0 %v3695_v19 }
  0x89   : > { %3138 = vmatprep.mubr.msk.f32.mxu0 %vm3616_vm1, %v3617_v5 }
  0x8c   : > { %3139 = vmatmul.mubr.f32.gmra.mrb[10].mxu0 %v3699_v25 }
  0x8d   : > { %3145 = vmatprep.mubr.msk.f32.mxu0 %vm3616_vm1, %v3617_v5 }
  0x90   : > { %3146 = vmatmul.mubr.f32.vlgmr.msra.gmra.mrb[6].mxu0 %v3662_v6 }
  0x91   : > { %3148 = vmatprep.mubr.msk.f32.mxu0 %vm3616_vm1, %v3617_v5  ;;  %3406 = vmatpush3.bf16.msra.mxu0 %v3390_v63 }
  0x92   : > { %3407 = vmatprep.subr.bf16.mxu0 %v3615_v1 }
  0x94   : > { %3149 = vmatmul.mubr.f32.gmra.mrb[8].mxu0 %v3668_v9 }
  0x95   : > { %3151 = vmatprep.mubr.msk.f32.mxu0 %vm3616_vm1, %v3617_v5 }
  0x98   : > { %3152 = vmatmul.mubr.f32.gmra.mrb[10].mxu0 %v3670_v10 }
  0x99   : > { %3158 = vmatprep.mubr.msk.f32.mxu0 %vm3616_vm1, %v3617_v5 }
  0x9c   : > { %3159 = vmatmul.mubr.f32.vlgmr.msra.gmra.mrb[6].mxu0 %v3662_v6  ;;  %v1871_v6 = vld [vmem:[%s4217_s2 + $0x8] sm:$0xff] }
  0x9d   : > { %3161 = vmatprep.mubr.msk.f32.mxu0 %vm3616_vm1, %v3617_v5  ;;  %v1903_v13 = vand.u32 4294901760, %v1871_v6 }
  0xa0   : > { %3162 = vmatmul.mubr.f32.gmra.mrb[8].mxu0 %v3668_v9  ;;  %v2065_v9 = vsub.f32 %v1871_v6, %v1903_v13 }
  0xa1   : > { %3164 = vmatprep.mubr.msk.f32.mxu0 %vm3616_vm1, %v3617_v5 }
  0xa2   : > { %v3414_v16 = vpack.c.bf16 %v2065_v9, %v2058_v14  ;;  %v2066_v18 = vand.u32 4294901760, %v2065_v9 }
  0xa4   : > { %3165 = vmatmul.mubr.f32.gmra.mrb[10].mxu0 %v3670_v10  ;;  %3415 = vmatpush3.bf16.msra.mxu1 %v3414_v16  ;;  %v3946_v10 = vpack.c.bf16 %v1903_v13, %v1900_v12  ;;  %v3950_v19 = vpack.c.bf16 %v2066_v18, %v2059_v17  ;;  %v2067_v35 = vsub.f32 %v2065_v9, %v2066_v18 }
  0xa5   : > { %3171 = vmatprep.mubr.msk.f32.mxu0 %vm3616_vm1, %v3617_v5  ;;  %3416 = vmatprep.subr.bf16.mxu1 %v3615_v1 }
  0xa6   : > { %3409 = vmatpush3.bf16.msra.mxu0 %v3946_v10  ;;  %v2068_v45 = vand.u32 4294901760, %v2067_v35 }
  0xa7   : > { %3410 = vmatprep.subr.bf16.mxu0 %v3615_v1 }
  0xa8   : > { %v3411_v55 = vpack.c.bf16 %v2068_v45, %v2061_v44 }
 0x127   : > { %v718_v20 = vpop.f32.mrb[0].mxu0 }
 0x128   : > { %734 = vst.msk [vmem:[#allocation2] sm:$0xff] %vm179_vm0, %v718_v20  ;;  %v3004_v21 = vpop.f32.mrb[1].mxu0  ;;  %v1280_v22 = vpop.f32.mrb[0].mxu1 }
 0x129   : > { %1296 = vst.msk [vmem:[#allocation2 + $0x18] sm:$0xff] %vm179_vm0, %v1280_v22  ;;  %v3082_v23 = vpop.f32.mrb[1].mxu1 }
 0x12b   : > { %v724_v24 = vpop.f32.mrb[2].mxu0 }
 0x12c   : > { %735 = vst.msk [vmem:[#allocation2 + $0x8] sm:$0xff] %vm179_vm0, %v724_v24  ;;  %v3007_v25 = vpop.f32.mrb[3].mxu0  ;;  %v1286_v26 = vpop.f32.mrb[2].mxu1 }
 0x12d   : > { %1297 = vst.msk [vmem:[#allocation2 + $0x20] sm:$0xff] %vm179_vm0, %v1286_v26  ;;  %v3085_v27 = vpop.f32.mrb[3].mxu1 }
 0x12f   : > { %v730_v28 = vpop.f32.mrb[4].mxu0  ;;  %v1861_v29 = vld [vmem:[#allocation2] sm:$0xff] }
 0x130   : > { %736 = vst.msk [vmem:[#allocation2 + $0x10] sm:$0xff] %vm179_vm0, %v730_v28  ;;  %v3010_v30 = vpop.f32.mrb[5].mxu0  ;;  %v1292_v31 = vpop.f32.mrb[4].mxu1  ;;  %v1873_v32 = vsel %vm179_vm0, %v1861_v29, 0  ;;  %v1864_v33 = vld [vmem:[#allocation2 + $0x18] sm:$0xff] }
 0x131   : > { %1298 = vst.msk [vmem:[#allocation2 + $0x28] sm:$0xff] %vm179_vm0, %v1292_v31  ;;  %v3088_v36 = vpop.f32.mrb[5].mxu1  ;;  %v3959_v37 = vand.u32 4294901760, %v1873_v32  ;;  %v1882_v38 = vsel %vm179_vm0, %v1864_v33, 0 }
 0x132   : > { %v3966_v42 = vand.u32 4294901760, %v1882_v38 }
 0x133   : > { %v3963_v39 = vsub.f32 %v1873_v32, %v3959_v37  ;;  %v1862_v40 = vld [vmem:[#allocation2 + $0x8] sm:$0xff] }
 0x134   : > { %v1876_v41 = vsel %vm179_vm0, %v1862_v40, 0  ;;  %v1865_v43 = vld [vmem:[#allocation2 + $0x20] sm:$0xff]  ;;  %v3985_v53 = vsub.f32 %v1882_v38, %v3966_v42 }
 0x135   : > { %3234 = vmatmul.mubr.f32.vlgmr.msra.gmra.mrb[6].mxu1 %v3963_v39  ;;  %v3969_v46 = vand.u32 4294901760, %v1876_v41  ;;  %v1968_v47 = vand.u32 4294901760, %v3963_v39  ;;  %v1885_v48 = vsel %vm179_vm0, %v1865_v43, 0 }
 0x136   : > { %3236 = vmatprep.mubr.msk.f32.mxu1 %vm3616_vm1, %v3617_v5  ;;  %3418 = vmatpush3.bf16.msra.mxu1 %v3946_v10  ;;  %v3991_v59 = vand.u32 4294901760, %v1885_v48  ;;  %v1998_v63 = vand.u32 4294901760, %v3985_v53 }
 0x137   : > { %v3977_v49 = vsub.f32 %v1876_v41, %v3969_v46  ;;  %v1969_v50 = vsub.f32 %v3963_v39, %v1968_v47  ;;  %v1863_v51 = vld [vmem:[#allocation2 + $0x10] sm:$0xff]  ;;  %3419 = vmatprep.subr.bf16.mxu1 %v3615_v1 }
 0x138   : > { %v1879_v52 = vsel %vm179_vm0, %v1863_v51, 0  ;;  %v1866_v54 = vld [vmem:[#allocation2 + $0x28] sm:$0xff]  ;;  %v4008_v3 = vsub.f32 %v1885_v48, %v3991_v59  ;;  %v1999_v15 = vsub.f32 %v3985_v53, %v1998_v63 }
 0x139   : > { %3237 = vmatmul.mubr.f32.gmra.mrb[8].mxu1 %v3977_v49  ;;  %v1970_v56 = vand.u32 4294901760, %v1969_v50  ;;  %v3988_v57 = vand.u32 4294901760, %v1879_v52  ;;  %v1978_v58 = vand.u32 4294901760, %v3977_v49  ;;  %v1888_v60 = vsel %vm179_vm0, %v1866_v54, 0 }
 0x13a   : > { %3239 = vmatprep.mubr.msk.f32.mxu1 %vm3616_vm1, %v3617_v5  ;;  %v4010_v4 = vand.u32 4294901760, %v1888_v60  ;;  %v2008_v6 = vand.u32 4294901760, %v4008_v3  ;;  %v2000_v12 = vand.u32 4294901760, %v1999_v15 }
 0x13b   : > { %3172 = vmatmul.mubr.f32.vlgmr.msra.gmra.mrb[12].mxu0 %v1970_v56  ;;  %v3997_v61 = vsub.f32 %v1879_v52, %v3988_v57  ;;  %v1979_v62 = vsub.f32 %v3977_v49, %v1978_v58 }
 0x13c   : > { %3174 = vmatprep.mubr.msk.f32.mxu0 %vm3616_vm1, %v3617_v5  ;;  %3412 = vmatpush3.bf16.msra.mxu0 %v3411_v55  ;;  %v4024_v11 = vsub.f32 %v1888_v60, %v4010_v4  ;;  %v2009_v13 = vsub.f32 %v4008_v3, %v2008_v6 }
 0x13d   : > { %3240 = vmatmul.mubr.f32.gmra.mrb[10].mxu1 %v3997_v61  ;;  %v1980_v0 = vand.u32 4294901760, %v1979_v62  ;;  %v1988_v2 = vand.u32 4294901760, %v3997_v61 }
 0x13e   : > { %3242 = vmatprep.mubr.msk.f32.mxu1 %vm3616_vm1, %v3617_v5  ;;  %v2018_v14 = vand.u32 4294901760, %v4024_v11  ;;  %v2010_v9 = vand.u32 4294901760, %v2009_v13 }
 0x13f   : > { %3175 = vmatmul.mubr.f32.gmra.mrb[14].mxu0 %v1980_v0  ;;  %v1989_v7 = vsub.f32 %v3997_v61, %v1988_v2 }
 0x140   : > { %3177 = vmatprep.mubr.msk.f32.mxu0 %vm3616_vm1, %v3617_v5  ;;  %v2019_v16 = vsub.f32 %v4024_v11, %v2018_v14 }
 0x141   : > { %3243 = vmatmul.mubr.f32.gmra.mrb[12].mxu1 %v3985_v53  ;;  %v1990_v8 = vand.u32 4294901760, %v1989_v7 }
 0x142   : > { %3245 = vmatprep.mubr.msk.f32.mxu1 %vm3616_vm1, %v3617_v5  ;;  %v2020_v17 = vand.u32 4294901760, %v2019_v16 }
 0x143   : > { %3178 = vmatmul.mubr.f32.gmra.mrb[16].mxu0 %v1990_v8 }
 0x144   : > { %3180 = vmatprep.mubr.msk.f32.mxu0 %vm3616_vm1, %v3617_v5 }
 0x145   : > { %3246 = vmatmul.mubr.f32.gmra.mrb[14].mxu1 %v4008_v3 }
 0x146   : > { %3248 = vmatprep.mubr.msk.f32.mxu1 %vm3616_vm1, %v3617_v5 }
 0x147   : > { %3181 = vmatmul.mubr.f32.gmra.mrb[18].mxu0 %v2000_v12 }
 0x148   : > { %3183 = vmatprep.mubr.msk.f32.mxu0 %vm3616_vm1, %v3617_v5 }
 0x149   : > { %3249 = vmatmul.mubr.f32.gmra.mrb[16].mxu1 %v4024_v11 }
 0x14a   : > { %3251 = vmatprep.mubr.msk.f32.mxu1 %vm3616_vm1, %v3617_v5 }
 0x14b   : > { %3184 = vmatmul.mubr.f32.gmra.mrb[20].mxu0 %v2010_v9 }
 0x14c   : > { %3186 = vmatprep.mubr.msk.f32.mxu0 %vm3616_vm1, %v3617_v5 }
 0x14f   : > { %3187 = vmatmul.mubr.f32.gmra.mrb[22].mxu0 %v2020_v17 }
 0x150   : > { %3189 = vmatprep.mubr.msk.f32.mxu0 %vm3616_vm1, %v3617_v5 }
 0x16f   : > { %v1842_v18 = vpop.f32.mrb[6].mxu0 }
 0x170   : > { %1858 = vst.msk [vmem:[#allocation2 + $0x30] sm:$0xff] %vm179_vm0, %v1842_v18  ;;  %v3160_v20 = vpop.f32.mrb[7].mxu0 }
 0x173   : > { %v1848_v21 = vpop.f32.mrb[8].mxu0 }
 0x174   : > { %1859 = vst.msk [vmem:[#allocation2 + $0x38] sm:$0xff] %vm179_vm0, %v1848_v21  ;;  %v3163_v22 = vpop.f32.mrb[9].mxu0 }
 0x177   : > { %v1854_v23 = vpop.f32.mrb[10].mxu0  ;;  %v1867_v24 = vld [vmem:[#allocation2 + $0x30] sm:$0xff] }
 0x178   : > { %1860 = vst.msk [vmem:[#allocation2 + $0x40] sm:$0xff] %vm179_vm0, %v1854_v23  ;;  %v3166_v25 = vpop.f32.mrb[11].mxu0  ;;  %v1891_v26 = vsel %vm179_vm0, %v1867_v24, 0 }
 0x179   : > { %v4054_v27 = vand.u32 4294901760, %v1891_v26 }
 0x17b   : > { %v2027_v28 = vsub.f32 %v1891_v26, %v4054_v27  ;;  %v1868_v29 = vld [vmem:[#allocation2 + $0x38] sm:$0xff] }
 0x17c   : > { %v1894_v30 = vsel %vm179_vm0, %v1868_v29, 0 }
 0x17d   : > { %3252 = vmatmul.mubr.f32.gmra.mrb[18].mxu1 %v2027_v28  ;;  %v4058_v31 = vand.u32 4294901760, %v1894_v30  ;;  %v2028_v32 = vand.u32 4294901760, %v2027_v28 }
 0x17e   : > { %3254 = vmatprep.mubr.msk.f32.mxu1 %vm3616_vm1, %v3617_v5 }
 0x17f   : > { %v2037_v33 = vsub.f32 %v1894_v30, %v4058_v31  ;;  %v2029_v34 = vsub.f32 %v2027_v28, %v2028_v32  ;;  %v1869_v35 = vld [vmem:[#allocation2 + $0x40] sm:$0xff] }
 0x180   : > { %v1897_v36 = vsel %vm179_vm0, %v1869_v35, 0 }
 0x181   : > { %3255 = vmatmul.mubr.f32.gmra.mrb[20].mxu1 %v2037_v33  ;;  %v2030_v38 = vand.u32 4294901760, %v2029_v34  ;;  %v4064_v40 = vand.u32 4294901760, %v1897_v36  ;;  %v2038_v41 = vand.u32 4294901760, %v2037_v33 }
 0x182   : > { %3257 = vmatprep.mubr.msk.f32.mxu1 %vm3616_vm1, %v3617_v5 }
 0x183   : > { %3190 = vmatmul.mubr.f32.gmra.mrb[24].mxu0 %v2030_v38  ;;  %v2047_v43 = vsub.f32 %v1897_v36, %v4064_v40  ;;  %v2039_v44 = vsub.f32 %v2037_v33, %v2038_v41 }
 0x184   : > { %3192 = vmatprep.mubr.msk.f32.mxu0 %vm3616_vm1, %v3617_v5 }
 0x185   : > { %3258 = vmatmul.mubr.f32.gmra.mrb[22].mxu1 %v2047_v43  ;;  %v2040_v45 = vand.u32 4294901760, %v2039_v44  ;;  %v2048_v48 = vand.u32 4294901760, %v2047_v43 }
 0x186   : > { %3264 = vmatprep.mubr.msk.f32.mxu1 %vm3616_vm1, %v3617_v5 }
 0x187   : > { %3193 = vmatmul.mubr.f32.gmra.mrb[26].mxu0 %v2040_v45  ;;  %v2049_v50 = vsub.f32 %v2047_v43, %v2048_v48 }
 0x188   : > { %3195 = vmatprep.mubr.msk.f32.mxu0 %vm3616_vm1, %v3617_v5 }
 0x189   : > { %3265 = vmatmul.mubr.f32.vlgmr.msra.gmra.mrb[6].mxu1 %v1968_v47  ;;  %v2050_v51 = vand.u32 4294901760, %v2049_v50 }
 0x18a   : > { %3267 = vmatprep.mubr.msk.f32.mxu1 %vm3616_vm1, %v3617_v5  ;;  %3421 = vmatpush3.bf16.msra.mxu1 %v3950_v19 }
 0x18b   : > { %3196 = vmatmul.mubr.f32.gmra.mrb[28].mxu0 %v2050_v51  ;;  %3422 = vmatprep.subr.bf16.mxu1 %v3615_v1 }
 0x18c   : > { %3202 = vmatprep.mubr.msk.f32.mxu0 %vm3616_vm1, %v3617_v5 }
 0x18d   : > { %3268 = vmatmul.mubr.f32.gmra.mrb[8].mxu1 %v1978_v58 }
 0x18e   : > { %3270 = vmatprep.mubr.msk.f32.mxu1 %vm3616_vm1, %v3617_v5 }
 0x18f   : > { %3203 = vmatmul.mubr.f32.vlgmr.msra.gmra.mrb[12].mxu0 %v3959_v37 }
 0x190   : > { %3205 = vmatprep.mubr.msk.f32.mxu0 %vm3616_vm1, %v3617_v5 }
 0x191   : > { %3271 = vmatmul.mubr.f32.gmra.mrb[10].mxu1 %v1988_v2 }
 0x192   : > { %3273 = vmatprep.mubr.msk.f32.mxu1 %vm3616_vm1, %v3617_v5 }
 0x193   : > { %3206 = vmatmul.mubr.f32.gmra.mrb[14].mxu0 %v3969_v46 }
 0x194   : > { %3208 = vmatprep.mubr.msk.f32.mxu0 %vm3616_vm1, %v3617_v5 }
 0x195   : > { %3274 = vmatmul.mubr.f32.gmra.mrb[12].mxu1 %v1998_v63 }
 0x196   : > { %3276 = vmatprep.mubr.msk.f32.mxu1 %vm3616_vm1, %v3617_v5 }
 0x197   : > { %3209 = vmatmul.mubr.f32.gmra.mrb[16].mxu0 %v3988_v57 }
 0x198   : > { %3211 = vmatprep.mubr.msk.f32.mxu0 %vm3616_vm1, %v3617_v5 }
 0x199   : > { %3277 = vmatmul.mubr.f32.gmra.mrb[14].mxu1 %v2008_v6 }
 0x19a   : > { %3279 = vmatprep.mubr.msk.f32.mxu1 %vm3616_vm1, %v3617_v5 }
 0x19b   : > { %3212 = vmatmul.mubr.f32.gmra.mrb[18].mxu0 %v3966_v42 }
 0x19c   : > { %3214 = vmatprep.mubr.msk.f32.mxu0 %vm3616_vm1, %v3617_v5 }
 0x19d   : > { %3280 = vmatmul.mubr.f32.gmra.mrb[16].mxu1 %v2018_v14 }
 0x19e   : > { %3282 = vmatprep.mubr.msk.f32.mxu1 %vm3616_vm1, %v3617_v5 }
 0x19f   : > { %3215 = vmatmul.mubr.f32.gmra.mrb[20].mxu0 %v3991_v59 }
 0x1a0   : > { %3217 = vmatprep.mubr.msk.f32.mxu0 %vm3616_vm1, %v3617_v5 }
 0x1a1   : > { %3283 = vmatmul.mubr.f32.gmra.mrb[18].mxu1 %v2028_v32 }
 0x1a2   : > { %3285 = vmatprep.mubr.msk.f32.mxu1 %vm3616_vm1, %v3617_v5 }
 0x1a3   : > { %3218 = vmatmul.mubr.f32.gmra.mrb[22].mxu0 %v4010_v4 }
 0x1a4   : > { %3220 = vmatprep.mubr.msk.f32.mxu0 %vm3616_vm1, %v3617_v5 }
 0x1a5   : > { %3286 = vmatmul.mubr.f32.gmra.mrb[20].mxu1 %v2038_v41 }
 0x1a6   : > { %3288 = vmatprep.mubr.msk.f32.mxu1 %vm3616_vm1, %v3617_v5 }
 0x1a7   : > { %3221 = vmatmul.mubr.f32.gmra.mrb[24].mxu0 %v4054_v27 }
 0x1a8   : > { %3223 = vmatprep.mubr.msk.f32.mxu0 %vm3616_vm1, %v3617_v5 }
 0x1a9   : > { %3289 = vmatmul.mubr.f32.gmra.mrb[22].mxu1 %v2048_v48 }
 0x1aa   : > { %3295 = vmatprep.mubr.msk.f32.mxu1 %vm3616_vm1, %v3617_v5 }
 0x1ab   : > { %3224 = vmatmul.mubr.f32.gmra.mrb[26].mxu0 %v4058_v31 }
 0x1ac   : > { %3226 = vmatprep.mubr.msk.f32.mxu0 %vm3616_vm1, %v3617_v5 }
 0x1ad   : > { %3296 = vmatmul.mubr.f32.vlgmr.msra.gmra.mrb[6].mxu1 %v3959_v37 }
 0x1ae   : > { %3298 = vmatprep.mubr.msk.f32.mxu1 %vm3616_vm1, %v3617_v5  ;;  %3424 = vmatpush3.bf16.msra.mxu1 %v3946_v10 }
 0x1af   : > { %3227 = vmatmul.mubr.f32.gmra.mrb[28].mxu0 %v4064_v40 }
 0x1b1   : > { %3299 = vmatmul.mubr.f32.gmra.mrb[8].mxu1 %v3969_v46 }
 0x1b2   : > { %3301 = vmatprep.mubr.msk.f32.mxu1 %vm3616_vm1, %v3617_v5 }
 0x1b5   : > { %3302 = vmatmul.mubr.f32.gmra.mrb[10].mxu1 %v3988_v57 }
 0x1b6   : > { %3304 = vmatprep.mubr.msk.f32.mxu1 %vm3616_vm1, %v3617_v5 }
 0x1b9   : > { %3305 = vmatmul.mubr.f32.gmra.mrb[12].mxu1 %v3966_v42 }
 0x1ba   : > { %3307 = vmatprep.mubr.msk.f32.mxu1 %vm3616_vm1, %v3617_v5 }
 0x1bd   : > { %3308 = vmatmul.mubr.f32.gmra.mrb[14].mxu1 %v3991_v59 }
 0x1be   : > { %3310 = vmatprep.mubr.msk.f32.mxu1 %vm3616_vm1, %v3617_v5 }
 0x1c1   : > { %3311 = vmatmul.mubr.f32.gmra.mrb[16].mxu1 %v4010_v4 }
 0x1c2   : > { %3313 = vmatprep.mubr.msk.f32.mxu1 %vm3616_vm1, %v3617_v5 }
 0x1c5   : > { %3314 = vmatmul.mubr.f32.gmra.mrb[18].mxu1 %v4054_v27 }
 0x1c6   : > { %3316 = vmatprep.mubr.msk.f32.mxu1 %vm3616_vm1, %v3617_v5 }
 0x1c9   : > { %3317 = vmatmul.mubr.f32.gmra.mrb[20].mxu1 %v4058_v31 }
 0x1ca   : > { %3319 = vmatprep.mubr.msk.f32.mxu1 %vm3616_vm1, %v3617_v5 }
 0x1cd   : > { %3320 = vmatmul.mubr.f32.gmra.mrb[22].mxu1 %v4064_v40 }
 0x1ce   : > { %3326 = vmatprep.mubr.msk.f32.mxu1 %vm3616_vm1, %v3617_v5 }
 0x1d1   : > { %3327 = vmatmul.mubr.f32.vlgmr.msra.gmra.mrb[6].mxu1 %v3959_v37 }
 0x1d2   : > { %3329 = vmatprep.mubr.msk.f32.mxu1 %vm3616_vm1, %v3617_v5 }
 0x1d5   : > { %3330 = vmatmul.mubr.f32.gmra.mrb[8].mxu1 %v3969_v46 }
 0x1d6   : > { %3332 = vmatprep.mubr.msk.f32.mxu1 %vm3616_vm1, %v3617_v5 }
 0x1d9   : > { %3333 = vmatmul.mubr.f32.gmra.mrb[10].mxu1 %v3988_v57 }
 0x1da   : > { %3335 = vmatprep.mubr.msk.f32.mxu1 %vm3616_vm1, %v3617_v5 }
 0x1dd   : > { %3336 = vmatmul.mubr.f32.gmra.mrb[12].mxu1 %v3966_v42 }
 0x1de   : > { %3338 = vmatprep.mubr.msk.f32.mxu1 %vm3616_vm1, %v3617_v5 }
 0x1e1   : > { %3339 = vmatmul.mubr.f32.gmra.mrb[14].mxu1 %v3991_v59 }
 0x1e2   : > { %3341 = vmatprep.mubr.msk.f32.mxu1 %vm3616_vm1, %v3617_v5 }
 0x1e5   : > { %3342 = vmatmul.mubr.f32.gmra.mrb[16].mxu1 %v4010_v4 }
 0x1e6   : > { %3344 = vmatprep.mubr.msk.f32.mxu1 %vm3616_vm1, %v3617_v5 }
 0x1e9   : > { %3345 = vmatmul.mubr.f32.gmra.mrb[18].mxu1 %v4054_v27 }
 0x1ea   : > { %3347 = vmatprep.mubr.msk.f32.mxu1 %vm3616_vm1, %v3617_v5 }
 0x1ed   : > { %3348 = vmatmul.mubr.f32.gmra.mrb[20].mxu1 %v4058_v31 }
 0x1ee   : > { %3350 = vmatprep.mubr.msk.f32.mxu1 %vm3616_vm1, %v3617_v5 }
 0x1f1   : > { %3351 = vmatmul.mubr.f32.gmra.mrb[22].mxu1 %v4064_v40 }
 0x262   : > { %v2133_v1 = vpop.f32.mrb[12].mxu0 }
 0x263   : > { %v3204_v10 = vpop.f32.mrb[13].mxu0 }
 0x266   : > { %v2139_v19 = vpop.f32.mrb[14].mxu0 }
 0x267   : > { %v3207_v37 = vpop.f32.mrb[15].mxu0 }
 0x26a   : > { %v2145_v39 = vpop.f32.mrb[16].mxu0 }
 0x26b   : > { %v3210_v42 = vpop.f32.mrb[17].mxu0 }
 0x26e   : > { %v2151_v46 = vpop.f32.mrb[18].mxu0 }
 0x26f   : > { %v3213_v47 = vpop.f32.mrb[19].mxu0 }
 0x272   : > { %v2157_v49 = vpop.f32.mrb[20].mxu0 }
 0x273   : > { %v3216_v52 = vpop.f32.mrb[21].mxu0 }
 0x276   : > { %v2163_v53 = vpop.f32.mrb[22].mxu0 }
 0x277   : > { %v3219_v54 = vpop.f32.mrb[23].mxu0 }
 0x27a   : > { %v2169_v55 = vpop.f32.mrb[24].mxu0 }
 0x27b   : > { %v3222_v56 = vpop.f32.mrb[25].mxu0 }
 0x27e   : > { %v2175_v57 = vpop.f32.mrb[26].mxu0 }
 0x27f   : > { %v3225_v58 = vpop.f32.mrb[27].mxu0 }
 0x282   : > { %v2181_v5 = vpop.f32.mrb[28].mxu0 }
 0x283   : > { %v3228_v59 = vpop.f32.mrb[29].mxu0 }
 0x2a4   : > { %v2650_v60 = vpop.f32.mrb[6].mxu1 }
 0x2a5   : > { %v3425_v61 = vadd.f32 %v2650_v60, %v2133_v1  ;;  %v3328_v62 = vpop.f32.mrb[7].mxu1 }
 0x2a7   : > { %2703 = vst.msk [vmem:[%s4192_s6] sm:$0xff] %vm2702_vm2, %v3425_v61 }
 0x2a8   : > { %v2656_v63 = vpop.f32.mrb[8].mxu1 }
 0x2a9   : > { %v3426_v0 = vadd.f32 %v2656_v63, %v2139_v19  ;;  %v3331_v2 = vpop.f32.mrb[9].mxu1 }
 0x2ab   : > { %2704 = vst.msk [vmem:[%s4192_s6 + $0x8] sm:$0xff] %vm2702_vm2, %v3426_v0 }
 0x2ac   : > { %v2662_v3 = vpop.f32.mrb[10].mxu1 }
 0x2ad   : > { %v3427_v4 = vadd.f32 %v2662_v3, %v2145_v39  ;;  %v3334_v7 = vpop.f32.mrb[11].mxu1 }
 0x2af   : > { %2705 = vst.msk [vmem:[%s4192_s6 + $0x10] sm:$0xff] %vm2702_vm2, %v3427_v4 }
 0x2b0   : > { %v2668_v8 = vpop.f32.mrb[12].mxu1 }
 0x2b1   : > { %v3428_v15 = vadd.f32 %v2668_v8, %v2151_v46  ;;  %v3337_v11 = vpop.f32.mrb[13].mxu1 }
 0x2b3   : > { %2706 = vst.msk [vmem:[%s4192_s6 + $0x18] sm:$0xff] %vm2702_vm2, %v3428_v15 }
 0x2b4   : > { %v2674_v6 = vpop.f32.mrb[14].mxu1 }
 0x2b5   : > { %v3429_v12 = vadd.f32 %v2674_v6, %v2157_v49  ;;  %v3340_v13 = vpop.f32.mrb[15].mxu1 }
 0x2b7   : > { %2707 = vst.msk [vmem:[%s4192_s6 + $0x20] sm:$0xff] %vm2702_vm2, %v3429_v12 }
 0x2b8   : > { %v2680_v14 = vpop.f32.mrb[16].mxu1 }
 0x2b9   : > { %v3430_v9 = vadd.f32 %v2680_v14, %v2163_v53  ;;  %v3343_v16 = vpop.f32.mrb[17].mxu1 }
 0x2bb   : > { %2708 = vst.msk [vmem:[%s4192_s6 + $0x28] sm:$0xff] %vm2702_vm2, %v3430_v9 }
 0x2bc   : > { %v2686_v17 = vpop.f32.mrb[18].mxu1 }
 0x2bd   : > { %v3431_v18 = vadd.f32 %v2686_v17, %v2169_v55  ;;  %v3346_v20 = vpop.f32.mrb[19].mxu1 }
 0x2bf   : > { %2709 = vst.msk [vmem:[%s4192_s6 + $0x30] sm:$0xff] %vm2702_vm2, %v3431_v18 }
 0x2c0   : > { %v2692_v21 = vpop.f32.mrb[20].mxu1 }
 0x2c1   : > { %v3432_v22 = vadd.f32 %v2692_v21, %v2175_v57  ;;  %v3349_v23 = vpop.f32.mrb[21].mxu1 }
 0x2c3   : > { %2710 = vst.msk [vmem:[%s4192_s6 + $0x38] sm:$0xff] %vm2702_vm2, %v3432_v22 }
 0x2c4   : > { %v2698_v24 = vpop.f32.mrb[22].mxu1 }
 0x2c5   : > { %v3433_v25 = vadd.f32 %v2698_v24, %v2181_v5  ;;  %v3352_v26 = vpop.f32.mrb[23].mxu1 }
 0x2c7   : > { %2711 = vst.msk [vmem:[%s4192_s6 + $0x40] sm:$0xff] %vm2702_vm2, %v3433_v25 }
 0x2c8 PF: > { %s13_s12 = sadd.s32 1, %s3613_s12  }
 0x2c9   : > { %p10_p5 = scmp.ge.s32.totalorder %s13_s12, 4  }
 0x2cb   :  { %12 = sbr.rel (!%p10_p5) target bundleno = 1 (0x1), region = 62 }

</bundles_post_ra>
